<compile_context>
chip_gen: v6e
topology: v6e:2x2x1
jax: 0.10.0
libtpu: 0.0.40
codegen_flags: <defaults>
</compile_context>

<pallas_src>
import functools

import numpy as np
import jax
import jax.numpy as jnp
from jax.experimental import pallas as pl
from jax.experimental.pallas import tpu as pltpu

LN_EPS = 1e-5


# ----------------------------- kernel ----------------------------------------


def _layer_norm(x, gamma, beta):
    mean = jnp.mean(x, axis=-1, keepdims=True)
    var = jnp.mean((x - mean) ** 2, axis=-1, keepdims=True)
    return (x - mean) * jax.lax.rsqrt(var + LN_EPS) * gamma + beta


def encoder_kernel(
    xpe_ref,                     # (M, D) f32: x + positional encoding (pre-summed)
    wqkv_ref, bqkv_ref, wo_ref, bo_ref,
    g1_ref, b1_ref,
    w1_ref, bf1_ref, w2_ref, bf2_ref,
    g2_ref, b2_ref,
    ng_ref, nb_ref,
    o_ref,
    h_ref,                       # VMEM scratch: carried residual stream (M, D) f32
    *, nhead, batch, seq_len,
):
    layer = pl.program_id(0)
    n_layers = pl.num_programs(0)

    M, D = xpe_ref.shape
    B, S = batch, seq_len
    hd = D // nhead

    # Seed the carried activation at the first layer step.
    @pl.when(layer == 0)
    def _():
        h_ref[...] = xpe_ref[...]

    h = h_ref[...]                               # (M, D) f32 residual stream
    h_bf = h.astype(jnp.bfloat16)

    # ---- fused QKV projection (1/sqrt(hd) folded into Wq and bq) ----
    qkv = jnp.dot(h_bf, wqkv_ref[0], preferred_element_type=jnp.float32) + bqkv_ref[0]
    q = qkv[:, :D].reshape(B, S, D).astype(jnp.bfloat16)
    k = qkv[:, D:2 * D].reshape(B, S, D).astype(jnp.bfloat16)
    v = qkv[:, 2 * D:].reshape(B, S, D).astype(jnp.bfloat16)

    # ---- multi-head self-attention (static unroll over heads, batched over B) ----
    # TODO(synk): a single (B*H)-batched score/PV einsum would remove the per-head
    #             slices, but requires an in-kernel (B,S,H,hd)->(B,H,S,hd) transpose
    #             that Mosaic does not support; kept unrolled for guaranteed lowering.
    heads = []
    for hh in range(nhead):
        sl = slice(hh * hd, (hh + 1) * hd)
        s = jnp.einsum('bqc,bkc->bqk', q[:, :, sl], k[:, :, sl],
                       preferred_element_type=jnp.float32)
        s = s - jnp.max(s, axis=-1, keepdims=True)
        p = jnp.exp(s)
        p = p * pl.reciprocal(jnp.sum(p, axis=-1, keepdims=True), approx=True)
        o_h = jnp.einsum('bqk,bkc->bqc', p.astype(jnp.bfloat16), v[:, :, sl],
                         preferred_element_type=jnp.float32)
        heads.append(o_h.reshape(M, hd))
    attn = jnp.concatenate(heads, axis=-1)                     # (M, D)
    attn = jnp.dot(attn.astype(jnp.bfloat16), wo_ref[0],
                   preferred_element_type=jnp.float32) + bo_ref[0]

    x1 = _layer_norm(h + attn, g1_ref[0], b1_ref[0])

    # ---- feed-forward (ReLU, width d_ff) ----
    h1 = jnp.dot(x1.astype(jnp.bfloat16), w1_ref[0],
                 preferred_element_type=jnp.float32) + bf1_ref[0]
    h1 = jnp.maximum(h1, 0.0)
    ff = jnp.dot(h1.astype(jnp.bfloat16), w2_ref[0],
                 preferred_element_type=jnp.float32) + bf2_ref[0]

    x2 = _layer_norm(x1 + ff, g2_ref[0], b2_ref[0])
    h_ref[...] = x2                                            # carry to next layer

    # Final LayerNorm + writeback only once, after the last layer.
    @pl.when(layer == n_layers - 1)
    def _():
        o_ref[...] = _layer_norm(x2, ng_ref[...], nb_ref[...]).astype(o_ref.dtype)


# ----------------------------- wrapper ----------------------------------------


def _layer_spec(stacked_shape):
    nd = len(stacked_shape)
    return pl.BlockSpec((1,) + tuple(stacked_shape[1:]),
                        lambda l, _nd=nd: (l,) + (0,) * (_nd - 1))


def _shared_spec(shape):
    nd = len(shape)
    return pl.BlockSpec(tuple(shape), lambda l, _nd=nd: (0,) * _nd)


def _vmem_capacity_bytes():
    try:
        return int(pltpu.get_tpu_info().vmem_capacity_bytes)
    except Exception:
        return 128 * 1024 * 1024   # conservative fallback (v5e/v6e physical)


def encoder_forward(x, params, nhead):
    B, S, D = x.shape
    M = B * S
    n_layers = params["wqkv"].shape[0]
    d_ff = params["w1"].shape[-1]

    # Positional encoding added here (plain XLA) so the kernel gets a single
    # pre-summed, lane-dense (M, D) activation input.
    xpe = (x + params["pe"]).reshape(M, D).astype(jnp.float32)

    stacked = [
        params["wqkv"], params["bqkv"], params["wo"], params["bo"],
        params["g1"], params["b1"],
        params["w1"], params["bf1"], params["w2"], params["bf2"],
        params["g2"], params["b2"],
    ]
    in_specs = (
        [pl.BlockSpec((M, D), lambda l: (0, 0))]               # x + pe (read at layer 0)
        + [_layer_spec(w.shape) for w in stacked]              # per-layer weights (streamed)
        + [_shared_spec(params["norm_g"].shape),               # final LN gamma
           _shared_spec(params["norm_b"].shape)]               # final LN beta
    )

    # ---- cost estimate (helps XLA schedule around the fused custom call) ----
    mm_flops = 2 * n_layers * M * (D * 3 * D + D * D + 2 * D * d_ff)
    attn_flops = 4 * n_layers * B * S * S * D                  # QK^T + PV
    weight_bytes = sum(int(np.prod(p.shape)) * p.dtype.itemsize for p in stacked)
    cost = pl.CostEstimate(
        flops=int(mm_flops + attn_flops),
        transcendentals=int(n_layers * B * nhead * S * S),     # softmax exp
        bytes_accessed=int(weight_bytes + M * D * 4 * 2),
    )

    # ---- explicit VMEM budget: double-buffered per-layer weights + activations ----
    per_layer_w_bytes = sum(int(np.prod(p.shape[1:])) * p.dtype.itemsize for p in stacked)
    est = 2 * per_layer_w_bytes + 4 * M * D * 4 + (8 << 20)    # weights(x2) + acts + margin
    vmem_limit = int(min(int(0.75 * _vmem_capacity_bytes()), max(est, 32 << 20)))

    out = pl.pallas_call(
        functools.partial(encoder_kernel, nhead=nhead, batch=B, seq_len=S),
        out_shape=jax.ShapeDtypeStruct((M, D), jnp.float32),
        grid=(n_layers,),
        in_specs=in_specs,
        out_specs=pl.BlockSpec((M, D), lambda l: (0, 0)),
        scratch_shapes=[pltpu.VMEM((M, D), jnp.float32)],
        compiler_params=pltpu.CompilerParams(
            dimension_semantics=("arbitrary",),
            vmem_limit_bytes=vmem_limit),
        cost_estimate=cost,
    )(xpe, *stacked, params["norm_g"], params["norm_b"])

    return out.reshape(B, S, D)


# ----------------------------- init -------------------------------------------


def build_pe(seq_len, d_model):
    # Exact mirror of the PyTorch double loop.
    pe = np.zeros((seq_len, d_model), dtype=np.float32)
    for pos in range(seq_len):
        for i in range(0, d_model, 2):
            pe[pos, i] = np.sin(pos / 10000 ** (2 * i / d_model))
            pe[pos, i + 1] = np.cos(pos / 10000 ** (2 * (i + 1) / d_model))
    return jnp.asarray(pe[None])  # (1, S, D)


def init_params(key, d_model, seq_len, n_layers, nhead, d_ff):
    hd = d_model // nhead
    scale = 1.0 / float(np.sqrt(hd))

    def dense(k, fi, fo):
        return jax.random.normal(k, (fi, fo), jnp.float32) * 0.05

    acc = {k: [] for k in ["wqkv", "bqkv", "wo", "bo", "g1", "b1",
                           "w1", "bf1", "w2", "bf2", "g2", "b2"]}
    for _ in range(n_layers):
        key, *ks = jax.random.split(key, 7)
        # 1/sqrt(head_dim) folded into BOTH Wq and bq so loaded (non-zero) biases
        # would also be scaled correctly.
        wq = dense(ks[0], d_model, d_model) * scale
        wk = dense(ks[1], d_model, d_model)
        wv = dense(ks[2], d_model, d_model)
        bq = jnp.zeros((d_model,), jnp.float32) * scale
        bk = jnp.zeros((d_model,), jnp.float32)
        bv = jnp.zeros((d_model,), jnp.float32)
        acc["wqkv"].append(jnp.concatenate([wq, wk, wv], axis=-1))
        acc["bqkv"].append(jnp.concatenate([bq, bk, bv])[None, :])
        acc["wo"].append(dense(ks[3], d_model, d_model))
        acc["bo"].append(jnp.zeros((1, d_model), jnp.float32))
        acc["g1"].append(jnp.ones((1, d_model), jnp.float32))
        acc["b1"].append(jnp.zeros((1, d_model), jnp.float32))
        acc["w1"].append(dense(ks[4], d_model, d_ff))
        acc["bf1"].append(jnp.zeros((1, d_ff), jnp.float32))
        acc["w2"].append(dense(ks[5], d_ff, d_model))
        acc["bf2"].append(jnp.zeros((1, d_model), jnp.float32))
        acc["g2"].append(jnp.ones((1, d_model), jnp.float32))
        acc["b2"].append(jnp.zeros((1, d_model), jnp.float32))

    params = {k: jnp.stack(v) for k, v in acc.items()}
    # Matmul operands in bf16 (MXU-native on v5e/v6e/v7x); accumulation stays f32.
    for k in ("wqkv", "wo", "w1", "w2"):
        params[k] = params[k].astype(jnp.bfloat16)
    params["pe"] = build_pe(seq_len, d_model)
    params["norm_g"] = jnp.ones((1, d_model), jnp.float32)
    params["norm_b"] = jnp.zeros((1, d_model), jnp.float32)
    return params


# ----------------------------- main -------------------------------------------


if __name__ == "__main__":
    B, S, D = 2, 8, 32          # batch, seq_len, d_model
    NHEAD = 4
    N_LAYERS = 2
    D_FF = 4 * D

    key = jax.random.PRNGKey(0)
    kx, kp = jax.random.split(key)
    x = jax.random.normal(kx, (B, S, D), jnp.float32)
    params = init_params(kp, D, S, N_LAYERS, NHEAD, D_FF)

    out = encoder_forward(x, params, NHEAD)
    out = jax.block_until_ready(out)

    assert out.shape == (B, S, D)
    assert bool(jnp.all(jnp.isfinite(out)))
    print("KERNEL_OK")
</pallas_src>

<mosaic_0001>
module attributes {stable_mosaic.version = 11 : i64} {
  func.func @encoder_kernel(%arg0: i32, %arg1: memref<16x32xf32, #tpu.memory_space<vmem>>, %arg2: memref<1x32x96xbf16, #tpu.memory_space<vmem>>, %arg3: memref<1x1x96xf32, #tpu.memory_space<vmem>>, %arg4: memref<1x32x32xbf16, #tpu.memory_space<vmem>>, %arg5: memref<1x1x32xf32, #tpu.memory_space<vmem>>, %arg6: memref<1x1x32xf32, #tpu.memory_space<vmem>>, %arg7: memref<1x1x32xf32, #tpu.memory_space<vmem>>, %arg8: memref<1x32x128xbf16, #tpu.memory_space<vmem>>, %arg9: memref<1x1x128xf32, #tpu.memory_space<vmem>>, %arg10: memref<1x128x32xbf16, #tpu.memory_space<vmem>>, %arg11: memref<1x1x32xf32, #tpu.memory_space<vmem>>, %arg12: memref<1x1x32xf32, #tpu.memory_space<vmem>>, %arg13: memref<1x1x32xf32, #tpu.memory_space<vmem>>, %arg14: memref<1x32xf32, #tpu.memory_space<vmem>>, %arg15: memref<1x32xf32, #tpu.memory_space<vmem>>, %arg16: memref<16x32xf32, #tpu.memory_space<vmem>>, %arg17: memref<16x32xf32, #tpu.memory_space<vmem>>) attributes {dimension_semantics = [#tpu.dimension_semantics<arbitrary>], iteration_bounds = array<i64: 2>, scalar_prefetch = 0 : i64, scratch_operands = 1 : i64, tpu.core_type = #tpu.core_type<tc>, window_params = [{pipeline_mode = #tpu.pipeline_mode<synchronous>, transform_indices = @transform_0, window_bounds = array<i64: 16, 32>}, {transform_indices = @transform_1, window_bounds = array<i64: 1, 32, 96>}, {transform_indices = @transform_2, window_bounds = array<i64: 1, 1, 96>}, {transform_indices = @transform_3, window_bounds = array<i64: 1, 32, 32>}, {transform_indices = @transform_4, window_bounds = array<i64: 1, 1, 32>}, {transform_indices = @transform_5, window_bounds = array<i64: 1, 1, 32>}, {transform_indices = @transform_6, window_bounds = array<i64: 1, 1, 32>}, {transform_indices = @transform_7, window_bounds = array<i64: 1, 32, 128>}, {transform_indices = @transform_8, window_bounds = array<i64: 1, 1, 128>}, {transform_indices = @transform_9, window_bounds = array<i64: 1, 128, 32>}, {transform_indices = @transform_10, window_bounds = array<i64: 1, 1, 32>}, {transform_indices = @transform_11, window_bounds = array<i64: 1, 1, 32>}, {transform_indices = @transform_12, window_bounds = array<i64: 1, 1, 32>}, {pipeline_mode = #tpu.pipeline_mode<synchronous>, transform_indices = @transform_13, window_bounds = array<i64: 1, 32>}, {pipeline_mode = #tpu.pipeline_mode<synchronous>, transform_indices = @transform_14, window_bounds = array<i64: 1, 32>}, {pipeline_mode = #tpu.pipeline_mode<synchronous>, transform_indices = @transform_15, window_bounds = array<i64: 16, 32>}]} {
    %c0_i32 = arith.constant 0 : i32
    %0 = arith.cmpi eq, %arg0, %c0_i32 : i32
    %1 = arith.extui %0 : i1 to i32
    %c0_i32_0 = arith.constant 0 : i32
    %2 = arith.cmpi ne, %1, %c0_i32_0 : i32
    scf.if %2 {
      %c0_71 = arith.constant 0 : index
      %c0_72 = arith.constant 0 : index
      %174 = vector.load %arg1[%c0_71, %c0_72] : memref<16x32xf32, #tpu.memory_space<vmem>>, vector<16x32xf32>
      %c0_73 = arith.constant 0 : index
      %c0_74 = arith.constant 0 : index
      %175 = vector.load %arg17[%c0_73, %c0_74] : memref<16x32xf32, #tpu.memory_space<vmem>>, vector<16x32xf32>
      tpu.vector_store %arg17[%c0_73, %c0_74], %174 {strides = array<i32>} : memref<16x32xf32, #tpu.memory_space<vmem>>, vector<16x32xf32>,
    } else {
    }
    %c0 = arith.constant 0 : index
    %c0_1 = arith.constant 0 : index
    %3 = vector.load %arg17[%c0, %c0_1] : memref<16x32xf32, #tpu.memory_space<vmem>>, vector<16x32xf32>
    %4 = arith.truncf %3 : vector<16x32xf32> to vector<16x32xbf16>
    %c0_2 = arith.constant 0 : index
    %c0_3 = arith.constant 0 : index
    %c0_4 = arith.constant 0 : index
    %5 = vector.load %arg2[%c0_2, %c0_3, %c0_4] : memref<1x32x96xbf16, #tpu.memory_space<vmem>>, vector<1x32x96xbf16>
    %6 = vector.shape_cast %5 : vector<1x32x96xbf16> to vector<32x96xbf16>
    %cst = arith.constant dense<0.000000e+00> : vector<16x96xf32>
    %7 = tpu.matmul %4, %6, %cst {dimension_numbers = #tpu.dot_dimension_numbers<[1], [0], [0], [1], [0, 0, 1, 1], [], []>} : vector<16x32xbf16>, vector<32x96xbf16>, vector<16x96xf32> -> vector<16x96xf32>
    %c0_5 = arith.constant 0 : index
    %c0_6 = arith.constant 0 : index
    %c0_7 = arith.constant 0 : index
    %8 = vector.load %arg3[%c0_5, %c0_6, %c0_7] : memref<1x1x96xf32, #tpu.memory_space<vmem>>, vector<1x1x96xf32>
    %9 = vector.shape_cast %8 : vector<1x1x96xf32> to vector<1x96xf32>
    %10 = vector.broadcast %9 : vector<1x96xf32> to vector<16x96xf32>
    %11 = arith.addf %7, %10 : vector<16x96xf32>
    %12 = vector.extract_strided_slice %11 {offsets = [0, 0], sizes = [16, 32], strides = [1, 1]} : vector<16x96xf32> to vector<16x32xf32>
    %13 = vector.shape_cast %12 : vector<16x32xf32> to vector<2x8x32xf32>
    %14 = arith.truncf %13 : vector<2x8x32xf32> to vector<2x8x32xbf16>
    %15 = vector.extract_strided_slice %11 {offsets = [0, 32], sizes = [16, 32], strides = [1, 1]} : vector<16x96xf32> to vector<16x32xf32>
    %16 = vector.shape_cast %15 : vector<16x32xf32> to vector<2x8x32xf32>
    %17 = arith.truncf %16 : vector<2x8x32xf32> to vector<2x8x32xbf16>
    %18 = vector.extract_strided_slice %11 {offsets = [0, 64], sizes = [16, 32], strides = [1, 1]} : vector<16x96xf32> to vector<16x32xf32>
    %19 = vector.shape_cast %18 : vector<16x32xf32> to vector<2x8x32xf32>
    %20 = arith.truncf %19 : vector<2x8x32xf32> to vector<2x8x32xbf16>
    %21 = vector.extract_strided_slice %14 {offsets = [0, 0, 0], sizes = [2, 8, 8], strides = [1, 1, 1]} : vector<2x8x32xbf16> to vector<2x8x8xbf16>
    %22 = vector.extract_strided_slice %17 {offsets = [0, 0, 0], sizes = [2, 8, 8], strides = [1, 1, 1]} : vector<2x8x32xbf16> to vector<2x8x8xbf16>
    "tpu.trace_start"() <{level = 10 : i32, message = "bqc,bkc->bqk"}> : () -> ()
    %cst_8 = arith.constant dense<0.000000e+00> : vector<2x8x8xf32>
    %23 = tpu.matmul %21, %22, %cst_8 {dimension_numbers = #tpu.dot_dimension_numbers<[2], [2], [1], [1], [0, 0, 0, 1, 1, 1], [0], [0]>} : vector<2x8x8xbf16>, vector<2x8x8xbf16>, vector<2x8x8xf32> -> vector<2x8x8xf32>
    "tpu.trace_stop"() : () -> ()
    %cst_9 = arith.constant dense<0xFF800000> : vector<2x8xf32>
    %24 = vector.multi_reduction <maximumf>, %23, %cst_9 [2] : vector<2x8x8xf32> to vector<2x8xf32>
    %25 = vector.shape_cast %24 : vector<2x8xf32> to vector<2x8x1xf32>
    %26 = vector.broadcast %25 : vector<2x8x1xf32> to vector<2x8x8xf32>
    %27 = arith.subf %23, %26 : vector<2x8x8xf32>
    %28 = math.exp %27 : vector<2x8x8xf32>
    %cst_10 = arith.constant dense<0.000000e+00> : vector<2x8xf32>
    %29 = vector.multi_reduction <add>, %28, %cst_10 [2] : vector<2x8x8xf32> to vector<2x8xf32>
    %30 = vector.shape_cast %29 : vector<2x8xf32> to vector<2x8x1xf32>
    %31 = tpu.reciprocal %30 {approx = true} : vector<2x8x1xf32> -> vector<2x8x1xf32>
    %32 = vector.broadcast %31 : vector<2x8x1xf32> to vector<2x8x8xf32>
    %33 = arith.mulf %28, %32 : vector<2x8x8xf32>
    %34 = arith.truncf %33 : vector<2x8x8xf32> to vector<2x8x8xbf16>
    %35 = vector.extract_strided_slice %20 {offsets = [0, 0, 0], sizes = [2, 8, 8], strides = [1, 1, 1]} : vector<2x8x32xbf16> to vector<2x8x8xbf16>
    "tpu.trace_start"() <{level = 10 : i32, message = "bqk,bkc->bqc"}> : () -> ()
    %cst_11 = arith.constant dense<0.000000e+00> : vector<2x8x8xf32>
    %36 = tpu.matmul %34, %35, %cst_11 {dimension_numbers = #tpu.dot_dimension_numbers<[2], [1], [1], [2], [0, 0, 0, 1, 1, 2], [0], [0]>} : vector<2x8x8xbf16>, vector<2x8x8xbf16>, vector<2x8x8xf32> -> vector<2x8x8xf32>
    "tpu.trace_stop"() : () -> ()
    %37 = vector.shape_cast %36 : vector<2x8x8xf32> to vector<16x8xf32>
    %38 = vector.extract_strided_slice %14 {offsets = [0, 0, 8], sizes = [2, 8, 8], strides = [1, 1, 1]} : vector<2x8x32xbf16> to vector<2x8x8xbf16>
    %39 = vector.extract_strided_slice %17 {offsets = [0, 0, 8], sizes = [2, 8, 8], strides = [1, 1, 1]} : vector<2x8x32xbf16> to vector<2x8x8xbf16>
    "tpu.trace_start"() <{level = 10 : i32, message = "bqc,bkc->bqk"}> : () -> ()
    %cst_12 = arith.constant dense<0.000000e+00> : vector<2x8x8xf32>
    %40 = tpu.matmul %38, %39, %cst_12 {dimension_numbers = #tpu.dot_dimension_numbers<[2], [2], [1], [1], [0, 0, 0, 1, 1, 1], [0], [0]>} : vector<2x8x8xbf16>, vector<2x8x8xbf16>, vector<2x8x8xf32> -> vector<2x8x8xf32>
    "tpu.trace_stop"() : () -> ()
    %cst_13 = arith.constant dense<0xFF800000> : vector<2x8xf32>
    %41 = vector.multi_reduction <maximumf>, %40, %cst_13 [2] : vector<2x8x8xf32> to vector<2x8xf32>
    %42 = vector.shape_cast %41 : vector<2x8xf32> to vector<2x8x1xf32>
    %43 = vector.broadcast %42 : vector<2x8x1xf32> to vector<2x8x8xf32>
    %44 = arith.subf %40, %43 : vector<2x8x8xf32>
    %45 = math.exp %44 : vector<2x8x8xf32>
    %cst_14 = arith.constant dense<0.000000e+00> : vector<2x8xf32>
    %46 = vector.multi_reduction <add>, %45, %cst_14 [2] : vector<2x8x8xf32> to vector<2x8xf32>
    %47 = vector.shape_cast %46 : vector<2x8xf32> to vector<2x8x1xf32>
    %48 = tpu.reciprocal %47 {approx = true} : vector<2x8x1xf32> -> vector<2x8x1xf32>
    %49 = vector.broadcast %48 : vector<2x8x1xf32> to vector<2x8x8xf32>
    %50 = arith.mulf %45, %49 : vector<2x8x8xf32>
    %51 = arith.truncf %50 : vector<2x8x8xf32> to vector<2x8x8xbf16>
    %52 = vector.extract_strided_slice %20 {offsets = [0, 0, 8], sizes = [2, 8, 8], strides = [1, 1, 1]} : vector<2x8x32xbf16> to vector<2x8x8xbf16>
    "tpu.trace_start"() <{level = 10 : i32, message = "bqk,bkc->bqc"}> : () -> ()
    %cst_15 = arith.constant dense<0.000000e+00> : vector<2x8x8xf32>
    %53 = tpu.matmul %51, %52, %cst_15 {dimension_numbers = #tpu.dot_dimension_numbers<[2], [1], [1], [2], [0, 0, 0, 1, 1, 2], [0], [0]>} : vector<2x8x8xbf16>, vector<2x8x8xbf16>, vector<2x8x8xf32> -> vector<2x8x8xf32>
    "tpu.trace_stop"() : () -> ()
    %54 = vector.shape_cast %53 : vector<2x8x8xf32> to vector<16x8xf32>
    %55 = vector.extract_strided_slice %14 {offsets = [0, 0, 16], sizes = [2, 8, 8], strides = [1, 1, 1]} : vector<2x8x32xbf16> to vector<2x8x8xbf16>
    %56 = vector.extract_strided_slice %17 {offsets = [0, 0, 16], sizes = [2, 8, 8], strides = [1, 1, 1]} : vector<2x8x32xbf16> to vector<2x8x8xbf16>
    "tpu.trace_start"() <{level = 10 : i32, message = "bqc,bkc->bqk"}> : () -> ()
    %cst_16 = arith.constant dense<0.000000e+00> : vector<2x8x8xf32>
    %57 = tpu.matmul %55, %56, %cst_16 {dimension_numbers = #tpu.dot_dimension_numbers<[2], [2], [1], [1], [0, 0, 0, 1, 1, 1], [0], [0]>} : vector<2x8x8xbf16>, vector<2x8x8xbf16>, vector<2x8x8xf32> -> vector<2x8x8xf32>
    "tpu.trace_stop"() : () -> ()
    %cst_17 = arith.constant dense<0xFF800000> : vector<2x8xf32>
    %58 = vector.multi_reduction <maximumf>, %57, %cst_17 [2] : vector<2x8x8xf32> to vector<2x8xf32>
    %59 = vector.shape_cast %58 : vector<2x8xf32> to vector<2x8x1xf32>
    %60 = vector.broadcast %59 : vector<2x8x1xf32> to vector<2x8x8xf32>
    %61 = arith.subf %57, %60 : vector<2x8x8xf32>
    %62 = math.exp %61 : vector<2x8x8xf32>
    %cst_18 = arith.constant dense<0.000000e+00> : vector<2x8xf32>
    %63 = vector.multi_reduction <add>, %62, %cst_18 [2] : vector<2x8x8xf32> to vector<2x8xf32>
    %64 = vector.shape_cast %63 : vector<2x8xf32> to vector<2x8x1xf32>
    %65 = tpu.reciprocal %64 {approx = true} : vector<2x8x1xf32> -> vector<2x8x1xf32>
    %66 = vector.broadcast %65 : vector<2x8x1xf32> to vector<2x8x8xf32>
    %67 = arith.mulf %62, %66 : vector<2x8x8xf32>
    %68 = arith.truncf %67 : vector<2x8x8xf32> to vector<2x8x8xbf16>
    %69 = vector.extract_strided_slice %20 {offsets = [0, 0, 16], sizes = [2, 8, 8], strides = [1, 1, 1]} : vector<2x8x32xbf16> to vector<2x8x8xbf16>
    "tpu.trace_start"() <{level = 10 : i32, message = "bqk,bkc->bqc"}> : () -> ()
    %cst_19 = arith.constant dense<0.000000e+00> : vector<2x8x8xf32>
    %70 = tpu.matmul %68, %69, %cst_19 {dimension_numbers = #tpu.dot_dimension_numbers<[2], [1], [1], [2], [0, 0, 0, 1, 1, 2], [0], [0]>} : vector<2x8x8xbf16>, vector<2x8x8xbf16>, vector<2x8x8xf32> -> vector<2x8x8xf32>
    "tpu.trace_stop"() : () -> ()
    %71 = vector.shape_cast %70 : vector<2x8x8xf32> to vector<16x8xf32>
    %72 = vector.extract_strided_slice %14 {offsets = [0, 0, 24], sizes = [2, 8, 8], strides = [1, 1, 1]} : vector<2x8x32xbf16> to vector<2x8x8xbf16>
    %73 = vector.extract_strided_slice %17 {offsets = [0, 0, 24], sizes = [2, 8, 8], strides = [1, 1, 1]} : vector<2x8x32xbf16> to vector<2x8x8xbf16>
    "tpu.trace_start"() <{level = 10 : i32, message = "bqc,bkc->bqk"}> : () -> ()
    %cst_20 = arith.constant dense<0.000000e+00> : vector<2x8x8xf32>
    %74 = tpu.matmul %72, %73, %cst_20 {dimension_numbers = #tpu.dot_dimension_numbers<[2], [2], [1], [1], [0, 0, 0, 1, 1, 1], [0], [0]>} : vector<2x8x8xbf16>, vector<2x8x8xbf16>, vector<2x8x8xf32> -> vector<2x8x8xf32>
    "tpu.trace_stop"() : () -> ()
    %cst_21 = arith.constant dense<0xFF800000> : vector<2x8xf32>
    %75 = vector.multi_reduction <maximumf>, %74, %cst_21 [2] : vector<2x8x8xf32> to vector<2x8xf32>
    %76 = vector.shape_cast %75 : vector<2x8xf32> to vector<2x8x1xf32>
    %77 = vector.broadcast %76 : vector<2x8x1xf32> to vector<2x8x8xf32>
    %78 = arith.subf %74, %77 : vector<2x8x8xf32>
    %79 = math.exp %78 : vector<2x8x8xf32>
    %cst_22 = arith.constant dense<0.000000e+00> : vector<2x8xf32>
    %80 = vector.multi_reduction <add>, %79, %cst_22 [2] : vector<2x8x8xf32> to vector<2x8xf32>
    %81 = vector.shape_cast %80 : vector<2x8xf32> to vector<2x8x1xf32>
    %82 = tpu.reciprocal %81 {approx = true} : vector<2x8x1xf32> -> vector<2x8x1xf32>
    %83 = vector.broadcast %82 : vector<2x8x1xf32> to vector<2x8x8xf32>
    %84 = arith.mulf %79, %83 : vector<2x8x8xf32>
    %85 = arith.truncf %84 : vector<2x8x8xf32> to vector<2x8x8xbf16>
    %86 = vector.extract_strided_slice %20 {offsets = [0, 0, 24], sizes = [2, 8, 8], strides = [1, 1, 1]} : vector<2x8x32xbf16> to vector<2x8x8xbf16>
    "tpu.trace_start"() <{level = 10 : i32, message = "bqk,bkc->bqc"}> : () -> ()
    %cst_23 = arith.constant dense<0.000000e+00> : vector<2x8x8xf32>
    %87 = tpu.matmul %85, %86, %cst_23 {dimension_numbers = #tpu.dot_dimension_numbers<[2], [1], [1], [2], [0, 0, 0, 1, 1, 2], [0], [0]>} : vector<2x8x8xbf16>, vector<2x8x8xbf16>, vector<2x8x8xf32> -> vector<2x8x8xf32>
    "tpu.trace_stop"() : () -> ()
    %88 = vector.shape_cast %87 : vector<2x8x8xf32> to vector<16x8xf32>
    %89 = tpu.concatenate %37, %54, %71, %88 in 1 : vector<16x8xf32>, vector<16x8xf32>, vector<16x8xf32>, vector<16x8xf32> -> vector<16x32xf32>
    %90 = arith.truncf %89 : vector<16x32xf32> to vector<16x32xbf16>
    %c0_24 = arith.constant 0 : index
    %c0_25 = arith.constant 0 : index
    %c0_26 = arith.constant 0 : index
    %91 = vector.load %arg4[%c0_24, %c0_25, %c0_26] : memref<1x32x32xbf16, #tpu.memory_space<vmem>>, vector<1x32x32xbf16>
    %92 = vector.shape_cast %91 : vector<1x32x32xbf16> to vector<32x32xbf16>
    %cst_27 = arith.constant dense<0.000000e+00> : vector<16x32xf32>
    %93 = tpu.matmul %90, %92, %cst_27 {dimension_numbers = #tpu.dot_dimension_numbers<[1], [0], [0], [1], [0, 0, 1, 1], [], []>} : vector<16x32xbf16>, vector<32x32xbf16>, vector<16x32xf32> -> vector<16x32xf32>
    %c0_28 = arith.constant 0 : index
    %c0_29 = arith.constant 0 : index
    %c0_30 = arith.constant 0 : index
    %94 = vector.load %arg5[%c0_28, %c0_29, %c0_30] : memref<1x1x32xf32, #tpu.memory_space<vmem>>, vector<1x1x32xf32>
    %95 = vector.shape_cast %94 : vector<1x1x32xf32> to vector<1x32xf32>
    %96 = vector.broadcast %95 : vector<1x32xf32> to vector<16x32xf32>
    %97 = arith.addf %93, %96 : vector<16x32xf32>
    %98 = arith.addf %3, %97 : vector<16x32xf32>
    %c0_31 = arith.constant 0 : index
    %c0_32 = arith.constant 0 : index
    %c0_33 = arith.constant 0 : index
    %99 = vector.load %arg6[%c0_31, %c0_32, %c0_33] : memref<1x1x32xf32, #tpu.memory_space<vmem>>, vector<1x1x32xf32>
    %100 = vector.shape_cast %99 : vector<1x1x32xf32> to vector<1x32xf32>
    %c0_34 = arith.constant 0 : index
    %c0_35 = arith.constant 0 : index
    %c0_36 = arith.constant 0 : index
    %101 = vector.load %arg7[%c0_34, %c0_35, %c0_36] : memref<1x1x32xf32, #tpu.memory_space<vmem>>, vector<1x1x32xf32>
    %102 = vector.shape_cast %101 : vector<1x1x32xf32> to vector<1x32xf32>
    %cst_37 = arith.constant dense<0.000000e+00> : vector<16xf32>
    %103 = vector.multi_reduction <add>, %98, %cst_37 [1] : vector<16x32xf32> to vector<16xf32>
    %104 = vector.shape_cast %103 : vector<16xf32> to vector<16x1xf32>
    %cst_38 = arith.constant 3.200000e+01 : f32
    %105 = vector.broadcast %cst_38 : f32 to vector<16x1xf32>
    %106 = arith.divf %104, %105 : vector<16x1xf32>
    %107 = vector.broadcast %106 : vector<16x1xf32> to vector<16x32xf32>
    %108 = arith.subf %98, %107 : vector<16x32xf32>
    %109 = arith.mulf %108, %108 : vector<16x32xf32>
    %cst_39 = arith.constant dense<0.000000e+00> : vector<16xf32>
    %110 = vector.multi_reduction <add>, %109, %cst_39 [1] : vector<16x32xf32> to vector<16xf32>
    %111 = vector.shape_cast %110 : vector<16xf32> to vector<16x1xf32>
    %cst_40 = arith.constant 3.200000e+01 : f32
    %112 = vector.broadcast %cst_40 : f32 to vector<16x1xf32>
    %113 = arith.divf %111, %112 : vector<16x1xf32>
    %114 = vector.broadcast %106 : vector<16x1xf32> to vector<16x32xf32>
    %115 = arith.subf %98, %114 : vector<16x32xf32>
    %cst_41 = arith.constant 9.99999974E-6 : f32
    %116 = vector.broadcast %cst_41 : f32 to vector<16x1xf32>
    %117 = arith.addf %113, %116 : vector<16x1xf32>
    %118 = math.rsqrt %117 : vector<16x1xf32>
    %119 = vector.broadcast %118 : vector<16x1xf32> to vector<16x32xf32>
    %120 = arith.mulf %115, %119 : vector<16x32xf32>
    %121 = vector.broadcast %100 : vector<1x32xf32> to vector<16x32xf32>
    %122 = arith.mulf %120, %121 : vector<16x32xf32>
    %123 = vector.broadcast %102 : vector<1x32xf32> to vector<16x32xf32>
    %124 = arith.addf %122, %123 : vector<16x32xf32>
    %125 = arith.truncf %124 : vector<16x32xf32> to vector<16x32xbf16>
    %c0_42 = arith.constant 0 : index
    %c0_43 = arith.constant 0 : index
    %c0_44 = arith.constant 0 : index
    %126 = vector.load %arg8[%c0_42, %c0_43, %c0_44] : memref<1x32x128xbf16, #tpu.memory_space<vmem>>, vector<1x32x128xbf16>
    %127 = vector.shape_cast %126 : vector<1x32x128xbf16> to vector<32x128xbf16>
    %cst_45 = arith.constant dense<0.000000e+00> : vector<16x128xf32>
    %128 = tpu.matmul %125, %127, %cst_45 {dimension_numbers = #tpu.dot_dimension_numbers<[1], [0], [0], [1], [0, 0, 1, 1], [], []>} : vector<16x32xbf16>, vector<32x128xbf16>, vector<16x128xf32> -> vector<16x128xf32>
    %c0_46 = arith.constant 0 : index
    %c0_47 = arith.constant 0 : index
    %c0_48 = arith.constant 0 : index
    %129 = vector.load %arg9[%c0_46, %c0_47, %c0_48] : memref<1x1x128xf32, #tpu.memory_space<vmem>>, vector<1x1x128xf32>
    %130 = vector.shape_cast %129 : vector<1x1x128xf32> to vector<1x128xf32>
    %131 = vector.broadcast %130 : vector<1x128xf32> to vector<16x128xf32>
    %132 = arith.addf %128, %131 : vector<16x128xf32>
    %cst_49 = arith.constant 0.000000e+00 : f32
    %133 = vector.broadcast %cst_49 : f32 to vector<16x128xf32>
    %134 = arith.maximumf %132, %133 : vector<16x128xf32>
    %135 = arith.truncf %134 : vector<16x128xf32> to vector<16x128xbf16>
    %c0_50 = arith.constant 0 : index
    %c0_51 = arith.constant 0 : index
    %c0_52 = arith.constant 0 : index
    %136 = vector.load %arg10[%c0_50, %c0_51, %c0_52] : memref<1x128x32xbf16, #tpu.memory_space<vmem>>, vector<1x128x32xbf16>
    %137 = vector.shape_cast %136 : vector<1x128x32xbf16> to vector<128x32xbf16>
    %cst_53 = arith.constant dense<0.000000e+00> : vector<16x32xf32>
    %138 = tpu.matmul %135, %137, %cst_53 {dimension_numbers = #tpu.dot_dimension_numbers<[1], [0], [0], [1], [0, 0, 1, 1], [], []>} : vector<16x128xbf16>, vector<128x32xbf16>, vector<16x32xf32> -> vector<16x32xf32>
    %c0_54 = arith.constant 0 : index
    %c0_55 = arith.constant 0 : index
    %c0_56 = arith.constant 0 : index
    %139 = vector.load %arg11[%c0_54, %c0_55, %c0_56] : memref<1x1x32xf32, #tpu.memory_space<vmem>>, vector<1x1x32xf32>
    %140 = vector.shape_cast %139 : vector<1x1x32xf32> to vector<1x32xf32>
    %141 = vector.broadcast %140 : vector<1x32xf32> to vector<16x32xf32>
    %142 = arith.addf %138, %141 : vector<16x32xf32>
    %143 = arith.addf %124, %142 : vector<16x32xf32>
    %c0_57 = arith.constant 0 : index
    %c0_58 = arith.constant 0 : index
    %c0_59 = arith.constant 0 : index
    %144 = vector.load %arg12[%c0_57, %c0_58, %c0_59] : memref<1x1x32xf32, #tpu.memory_space<vmem>>, vector<1x1x32xf32>
    %145 = vector.shape_cast %144 : vector<1x1x32xf32> to vector<1x32xf32>
    %c0_60 = arith.constant 0 : index
    %c0_61 = arith.constant 0 : index
    %c0_62 = arith.constant 0 : index
    %146 = vector.load %arg13[%c0_60, %c0_61, %c0_62] : memref<1x1x32xf32, #tpu.memory_space<vmem>>, vector<1x1x32xf32>
    %147 = vector.shape_cast %146 : vector<1x1x32xf32> to vector<1x32xf32>
    %cst_63 = arith.constant dense<0.000000e+00> : vector<16xf32>
    %148 = vector.multi_reduction <add>, %143, %cst_63 [1] : vector<16x32xf32> to vector<16xf32>
    %149 = vector.shape_cast %148 : vector<16xf32> to vector<16x1xf32>
    %cst_64 = arith.constant 3.200000e+01 : f32
    %150 = vector.broadcast %cst_64 : f32 to vector<16x1xf32>
    %151 = arith.divf %149, %150 : vector<16x1xf32>
    %152 = vector.broadcast %151 : vector<16x1xf32> to vector<16x32xf32>
    %153 = arith.subf %143, %152 : vector<16x32xf32>
    %154 = arith.mulf %153, %153 : vector<16x32xf32>
    %cst_65 = arith.constant dense<0.000000e+00> : vector<16xf32>
    %155 = vector.multi_reduction <add>, %154, %cst_65 [1] : vector<16x32xf32> to vector<16xf32>
    %156 = vector.shape_cast %155 : vector<16xf32> to vector<16x1xf32>
    %cst_66 = arith.constant 3.200000e+01 : f32
    %157 = vector.broadcast %cst_66 : f32 to vector<16x1xf32>
    %158 = arith.divf %156, %157 : vector<16x1xf32>
    %159 = vector.broadcast %151 : vector<16x1xf32> to vector<16x32xf32>
    %160 = arith.subf %143, %159 : vector<16x32xf32>
    %cst_67 = arith.constant 9.99999974E-6 : f32
    %161 = vector.broadcast %cst_67 : f32 to vector<16x1xf32>
    %162 = arith.addf %158, %161 : vector<16x1xf32>
    %163 = math.rsqrt %162 : vector<16x1xf32>
    %164 = vector.broadcast %163 : vector<16x1xf32> to vector<16x32xf32>
    %165 = arith.mulf %160, %164 : vector<16x32xf32>
    %166 = vector.broadcast %145 : vector<1x32xf32> to vector<16x32xf32>
    %167 = arith.mulf %165, %166 : vector<16x32xf32>
    %168 = vector.broadcast %147 : vector<1x32xf32> to vector<16x32xf32>
    %169 = arith.addf %167, %168 : vector<16x32xf32>
    %c0_68 = arith.constant 0 : index
    %c0_69 = arith.constant 0 : index
    %170 = vector.load %arg17[%c0_68, %c0_69] : memref<16x32xf32, #tpu.memory_space<vmem>>, vector<16x32xf32>
    tpu.vector_store %arg17[%c0_68, %c0_69], %169 {strides = array<i32>} : memref<16x32xf32, #tpu.memory_space<vmem>>, vector<16x32xf32>,
    %c1_i32 = arith.constant 1 : i32
    %171 = arith.cmpi eq, %arg0, %c1_i32 : i32
    %172 = arith.extui %171 : i1 to i32
    %c0_i32_70 = arith.constant 0 : i32
    %173 = arith.cmpi ne, %172, %c0_i32_70 : i32
    scf.if %173 {
      %c0_71 = arith.constant 0 : index
      %c0_72 = arith.constant 0 : index
      %174 = vector.load %arg14[%c0_71, %c0_72] : memref<1x32xf32, #tpu.memory_space<vmem>>, vector<1x32xf32>
      %c0_73 = arith.constant 0 : index
      %c0_74 = arith.constant 0 : index
      %175 = vector.load %arg15[%c0_73, %c0_74] : memref<1x32xf32, #tpu.memory_space<vmem>>, vector<1x32xf32>
      %cst_75 = arith.constant dense<0.000000e+00> : vector<16xf32>
      %176 = vector.multi_reduction <add>, %169, %cst_75 [1] : vector<16x32xf32> to vector<16xf32>
      %177 = vector.shape_cast %176 : vector<16xf32> to vector<16x1xf32>
      %cst_76 = arith.constant 3.200000e+01 : f32
      %178 = vector.broadcast %cst_76 : f32 to vector<16x1xf32>
      %179 = arith.divf %177, %178 : vector<16x1xf32>
      %180 = vector.broadcast %179 : vector<16x1xf32> to vector<16x32xf32>
      %181 = arith.subf %169, %180 : vector<16x32xf32>
      %182 = arith.mulf %181, %181 : vector<16x32xf32>
      %cst_77 = arith.constant dense<0.000000e+00> : vector<16xf32>
      %183 = vector.multi_reduction <add>, %182, %cst_77 [1] : vector<16x32xf32> to vector<16xf32>
      %184 = vector.shape_cast %183 : vector<16xf32> to vector<16x1xf32>
      %cst_78 = arith.constant 3.200000e+01 : f32
      %185 = vector.broadcast %cst_78 : f32 to vector<16x1xf32>
      %186 = arith.divf %184, %185 : vector<16x1xf32>
      %187 = vector.broadcast %179 : vector<16x1xf32> to vector<16x32xf32>
      %188 = arith.subf %169, %187 : vector<16x32xf32>
      %cst_79 = arith.constant 9.99999974E-6 : f32
      %189 = vector.broadcast %cst_79 : f32 to vector<16x1xf32>
      %190 = arith.addf %186, %189 : vector<16x1xf32>
      %191 = math.rsqrt %190 : vector<16x1xf32>
      %192 = vector.broadcast %191 : vector<16x1xf32> to vector<16x32xf32>
      %193 = arith.mulf %188, %192 : vector<16x32xf32>
      %194 = vector.broadcast %174 : vector<1x32xf32> to vector<16x32xf32>
      %195 = arith.mulf %193, %194 : vector<16x32xf32>
      %196 = vector.broadcast %175 : vector<1x32xf32> to vector<16x32xf32>
      %197 = arith.addf %195, %196 : vector<16x32xf32>
      %c0_80 = arith.constant 0 : index
      %c0_81 = arith.constant 0 : index
      %198 = vector.load %arg16[%c0_80, %c0_81] : memref<16x32xf32, #tpu.memory_space<vmem>>, vector<16x32xf32>
      tpu.vector_store %arg16[%c0_80, %c0_81], %197 {strides = array<i32>} : memref<16x32xf32, #tpu.memory_space<vmem>>, vector<16x32xf32>,
    } else {
    }
    return
  }
  func.func @transform_0(%arg0: i32) -> (i32, i32) {
    %c0_i32 = arith.constant 0 : i32
    %c0_i32_0 = arith.constant 0 : i32
    %c0_i32_1 = arith.constant 0 : i32
    return %c0_i32, %c0_i32_0 : i32, i32
  }
  func.func @transform_1(%arg0: i32) -> (i32, i32, i32) {
    %c0_i32 = arith.constant 0 : i32
    %c0_i32_0 = arith.constant 0 : i32
    %c0_i32_1 = arith.constant 0 : i32
    return %arg0, %c0_i32, %c0_i32_0 : i32, i32, i32
  }
  func.func @transform_2(%arg0: i32) -> (i32, i32, i32) {
    %c0_i32 = arith.constant 0 : i32
    %c0_i32_0 = arith.constant 0 : i32
    %c0_i32_1 = arith.constant 0 : i32
    return %arg0, %c0_i32, %c0_i32_0 : i32, i32, i32
  }
  func.func @transform_3(%arg0: i32) -> (i32, i32, i32) {
    %c0_i32 = arith.constant 0 : i32
    %c0_i32_0 = arith.constant 0 : i32
    %c0_i32_1 = arith.constant 0 : i32
    return %arg0, %c0_i32, %c0_i32_0 : i32, i32, i32
  }
  func.func @transform_4(%arg0: i32) -> (i32, i32, i32) {
    %c0_i32 = arith.constant 0 : i32
    %c0_i32_0 = arith.constant 0 : i32
    %c0_i32_1 = arith.constant 0 : i32
    return %arg0, %c0_i32, %c0_i32_0 : i32, i32, i32
  }
  func.func @transform_5(%arg0: i32) -> (i32, i32, i32) {
    %c0_i32 = arith.constant 0 : i32
    %c0_i32_0 = arith.constant 0 : i32
    %c0_i32_1 = arith.constant 0 : i32
    return %arg0, %c0_i32, %c0_i32_0 : i32, i32, i32
  }
  func.func @transform_6(%arg0: i32) -> (i32, i32, i32) {
    %c0_i32 = arith.constant 0 : i32
    %c0_i32_0 = arith.constant 0 : i32
    %c0_i32_1 = arith.constant 0 : i32
    return %arg0, %c0_i32, %c0_i32_0 : i32, i32, i32
  }
  func.func @transform_7(%arg0: i32) -> (i32, i32, i32) {
    %c0_i32 = arith.constant 0 : i32
    %c0_i32_0 = arith.constant 0 : i32
    %c0_i32_1 = arith.constant 0 : i32
    return %arg0, %c0_i32, %c0_i32_0 : i32, i32, i32
  }
  func.func @transform_8(%arg0: i32) -> (i32, i32, i32) {
    %c0_i32 = arith.constant 0 : i32
    %c0_i32_0 = arith.constant 0 : i32
    %c0_i32_1 = arith.constant 0 : i32
    return %arg0, %c0_i32, %c0_i32_0 : i32, i32, i32
  }
  func.func @transform_9(%arg0: i32) -> (i32, i32, i32) {
    %c0_i32 = arith.constant 0 : i32
    %c0_i32_0 = arith.constant 0 : i32
    %c0_i32_1 = arith.constant 0 : i32
    return %arg0, %c0_i32, %c0_i32_0 : i32, i32, i32
  }
  func.func @transform_10(%arg0: i32) -> (i32, i32, i32) {
    %c0_i32 = arith.constant 0 : i32
    %c0_i32_0 = arith.constant 0 : i32
    %c0_i32_1 = arith.constant 0 : i32
    return %arg0, %c0_i32, %c0_i32_0 : i32, i32, i32
  }
  func.func @transform_11(%arg0: i32) -> (i32, i32, i32) {
    %c0_i32 = arith.constant 0 : i32
    %c0_i32_0 = arith.constant 0 : i32
    %c0_i32_1 = arith.constant 0 : i32
    return %arg0, %c0_i32, %c0_i32_0 : i32, i32, i32
  }
  func.func @transform_12(%arg0: i32) -> (i32, i32, i32) {
    %c0_i32 = arith.constant 0 : i32
    %c0_i32_0 = arith.constant 0 : i32
    %c0_i32_1 = arith.constant 0 : i32
    return %arg0, %c0_i32, %c0_i32_0 : i32, i32, i32
  }
  func.func @transform_13(%arg0: i32) -> (i32, i32) {
    %c0_i32 = arith.constant 0 : i32
    %c0_i32_0 = arith.constant 0 : i32
    %c0_i32_1 = arith.constant 0 : i32
    return %c0_i32, %c0_i32_0 : i32, i32
  }
  func.func @transform_14(%arg0: i32) -> (i32, i32) {
    %c0_i32 = arith.constant 0 : i32
    %c0_i32_0 = arith.constant 0 : i32
    %c0_i32_1 = arith.constant 0 : i32
    return %c0_i32, %c0_i32_0 : i32, i32
  }
  func.func @transform_15(%arg0: i32) -> (i32, i32) {
    %c0_i32 = arith.constant 0 : i32
    %c0_i32_0 = arith.constant 0 : i32
    %c0_i32_1 = arith.constant 0 : i32
    return %c0_i32, %c0_i32_0 : i32, i32
  }
}

</mosaic_0001>

<bundles_post_ra>
// kernel: tpu_custom_call.1
= control target key start
LH: loop header
LB: loop body
LE: loop exit
PB: predicated region body
PF: predicated region fallthrough
CT: control target
= control target key end

     0   :  { %s3033_s0 = inlined_call_operand.vmem [shape: f32[16,32], index: 0, kind: input, shape index: {}]   ;;  %s3034_s1 = inlined_call_operand.vmem [shape: bf16[2,32,96], index: 1, kind: input, shape index: {}]   ;;  %s3035_s2 = inlined_call_operand.vmem [shape: f32[2,1,96], index: 2, kind: input, shape index: {}]   ;;  %s3036_s3 = inlined_call_operand.vmem [shape: bf16[2,32,32], index: 3, kind: input, shape index: {}]   ;;  %s3037_s4 = inlined_call_operand.vmem [shape: f32[2,1,32], index: 4, kind: input, shape index: {}]   ;;  %s3038_s5 = inlined_call_operand.vmem [shape: f32[2,1,32], index: 5, kind: input, shape index: {}]   ;;  %s3039_s6 = inlined_call_operand.vmem [shape: f32[2,1,32], index: 6, kind: input, shape index: {}]   ;;  %s3040_s7 = inlined_call_operand.vmem [shape: bf16[2,32,128], index: 7, kind: input, shape index: {}]   ;;  %s3041_s8 = inlined_call_operand.vmem [shape: f32[2,1,128], index: 8, kind: input, shape index: {}]   ;;  %s3042_s9 = inlined_call_operand.vmem [shape: bf16[2,128,32], index: 9, kind: input, shape index: {}]   ;;  %s3043_s10 = inlined_call_operand.vmem [shape: f32[2,1,32], index: 10, kind: input, shape index: {}]   ;;  %s3044_s11 = inlined_call_operand.vmem [shape: f32[2,1,32], index: 11, kind: input, shape index: {}]   ;;  %s3045_s12 = inlined_call_operand.vmem [shape: f32[2,1,32], index: 12, kind: input, shape index: {}]   ;;  %s3046_s13 = inlined_call_operand.vmem [shape: f32[1,32], index: 13, kind: input, shape index: {}]   ;;  %s3047_s14 = inlined_call_operand.vmem [shape: f32[1,32], index: 14, kind: input, shape index: {}]   ;;  %s3048_s15 = inlined_call_operand.hbm [shape: f32[16,32], index: 15, kind: output, shape index: {}]  }
   0x1   :  { %3051 = sst [smem:[#allocation7_spill]] %s3033_s0 }
   0x2   :  { %3052 = sst [smem:[#allocation8_spill]] %s3034_s1 }
   0x3   :  { %3053 = sst [smem:[#allocation9_spill]] %s3036_s3 }
   0x4   :  { %3054 = sst [smem:[#allocation10_spill]] %s3046_s13 }
   0x5   :  { %3055 = sst [smem:[#allocation11_spill]] %s3047_s14 }
   0x6   :  { %3056 = sst [smem:[#allocation12_spill]] %s3048_s15 }
   0x7   :  { %20 = vsyncpa [#allocation4], 0  ;;  %s2694_s18 = smov 0  }
   0x8 LB: > { %3057 = sst [smem:[#allocation6_spill]] %s2594_s18  ;;  %s2700_s19 = sadd.s32 4294967295, %s2594_s18   ;;  %s2594_s18 = sphi %s2694_s18, %s26_s18  }
   0x9   : > { %p2203_p0 = scmp.ge.s32.totalorder %s2594_s18, 1  ;;  %p527_p1 = scmp.lt.s32.totalorder %s2594_s18, 3 }
   0xb   : > { %p528_p2 = pnand %p2203_p0, %p527_p1 }
   0xc   : > { %p609_p3 = scmp.lt.s32.totalorder (!%p528_p2), %s2700_s19, 1  ;;  %s3058_s1 = sld [smem:[#allocation8_spill]] (!%p528_p2) }
   0xd   : > { %531 = sbr.rel (%p528_p2) target bundleno = 4294 (0x10c6), region = 80  ;;  %s3059_s3 = sld [smem:[#allocation9_spill]] (!%p528_p2) }
   0xe   : > { %p2212_p4 = scmp.ne.s32.totalorder (!%p528_p2), %s2700_s19, 0 }
  0x12   : > { %s2706_s20 = scalar_select %p609_p3, %s2700_s19, 1 }
  0x13   : > { %s3060_s16 = sld [smem:[#allocation7_spill]] (!%p2212_p4) }
  0x14   : > { %s2261_s21 = sshll.u32 %s2706_s20, 4  ;;  %s646_s0 = scalar_lea.vmem %s3043_s10, %s2706_s20 }
  0x15   : > { %s613_s27 = scalar_lea.vmem %s3058_s1, %s2261_s21  ;;  %s2719_s30 = scalar_lea.vmem %s3059_s3, %s2261_s21 }
  0x16   : > { %s2736_s26 = scalar_lea.vmem %s3040_s7, %s2261_s21  ;;  %s638_s1 = scalar_lea.vmem %s3041_s8, %s2706_s20 }
  0x17   : > { %s2264_s3 = sshll.u32 %s2706_s20, 6  ;;  %s649_s24 = scalar_lea.vmem %s3044_s11, %s2706_s20 }
  0x18   : > { %s2746_s18 = scalar_lea.vmem %s3042_s9, %s2264_s3  ;;  %s652_s13 = scalar_lea.vmem %s3045_s12, %s2706_s20 }
  0x19   : > { %657 = sbr.rel (%p2212_p4) target bundleno = 32 (0x20), region = 84 }
  0x1e   : > { %v658_v0 = vld [vmem:[%s3060_s16] sm:$0xff]  ;;  %vm660_vm0 = vcmask 261120   ;;  %v659_v1 = vld [vmem:[%s3060_s16 + $0x8] sm:$0xff] }
  0x1f   : > { %661 = vst.msk [vmem:[#allocation2] sm:$0xff] %vm660_vm0, %v658_v0  ;;  %662 = vst.msk [vmem:[#allocation2 + $0x8] sm:$0xff] %vm660_vm0, %v659_v1 }
  0x20 PF: > { %v2502_v2 = vld [vmem:[%s613_s27 + $0x8] sm:$0xff]   ;;  %v2596_v3 = vmov 0.0   ;;  %v2503_v4 = vld [vmem:[%s613_s27] sm:$0xff]   ;;  %vm2597_vm1 = vmmov 0   ;;  %vm689_vm2 = vcmask 261120   ;;  %s3061_s14 = scalar_lea.vmem %s3035_s2, %s2706_s20  ;;  %s2598_s15 = smov 96  }
  0x21   : > { %2315 = vmatprep.subr.bf16.mxu0 %v2596_v3  ;;  %2335 = vmatprep.subr.bf16.mxu1 %v2596_v3  ;;  %v2213_v8 = vld [vmem:[%s3061_s14] ss:$0 sm:$0xff]  ;;  %vm739_vm3 = vcmask 64512   ;;  %s2599_s22 = smov 64   ;;  %s2600_s21 = smov 88   ;;  %vm864_vm4 = vcmask 1043456  }
  0x22   : > { %2316 = vmatpush3.bf16.msra.mxu0 %v2502_v2  ;;  %2319 = vmatprep.mubr.msk.bf16.mxu0 %vm2597_vm1, %v2596_v3  ;;  %s2601_s25 = smov 120   ;;  %s2602_s28 = smov 56   ;;  %vm1642_vm5 = vcmask 130048   ;;  %vm1645_vm6 = vcmask 195584  }
  0x23   : > { %2317 = vmatprep.subr.bf16.mxu0 %v2596_v3  ;;  %2337 = vmatprep.mubr.msk.bf16.mxu1 %vm2597_vm1, %v2596_v3  ;;  %s2603_s29 = smov 80   ;;  %s2604_s3 = smov 112  }
  0x24   : > { %s2605_s17 = smov 48   ;;  %s2606_s27 = smov 72  }
  0x25   : > { %s2607_s23 = smov 104   ;;  %s2608_s14 = smov 40  }
  0x26   : > { %v2771_v5 = vld [vmem:[#allocation2] sm:$0xff]  ;;  %v2773_v6 = vld [vmem:[#allocation2 + $0x8] sm:$0xff]  ;;  %2318 = vmatpush3.bf16.msra.mxu0 %v2503_v4  ;;  %p2254_p5 = scmp.ne.s32.totalorder %s2700_s19, 1 }
  0x27   : > { %v665_v7 = vpack.c.bf16 %v2773_v6, %v2771_v5  ;;  %2323 = vmatprep.subr.bf16.mxu0 %v2596_v3 }
  0x29   : > { %2320 = vmatmul.mubr.msk.bf16.vlgmr.msra.gmra.mxu0 %vm689_vm2, %v665_v7 }
  0x2a   : > { %2325 = vmatprep.mubr.msk.bf16.mxu0 %vm2597_vm1, %v2596_v3 }
  0xe9   : > { %v727_v9 = vpop.f32.mrf.mxu0 }
  0xea   : > { %v728_v10 = vadd.f32 %v2213_v8, %v727_v9 }
  0xeb   : > { %v2321_v11 = vpop.f32.mrf.mxu0 }
  0xec   : > { %v2789_v12 = vpack.c.bf16 %v728_v10, %v728_v10 }
  0xed   : > { %v730_v13 = vpop.f32.mrf.mxu0 }
  0xee   : > { %v731_v14 = vadd.f32 %v2213_v8, %v730_v13  ;;  %737 = vrot.lane.b32.xlu0 %v2789_v12, %s2598_s15 }
  0xef   : > { %v2322_v15 = vpop.f32.mrf.mxu0 }
  0xf0   : > { %v2792_v16 = vpack.c.bf16 %v731_v14, %v731_v14 }
  0xf2   : > { %787 = vrot.lane.b32.xlu0 %v2792_v16, %s2598_s15  ;;  %s2609_s15 = smov 8  }
 0x160   : > { %v738_v17 = vpop.permute.xlu0 %737 }
 0x161   : > { %v744_v18 = vsel %vm739_vm3, %v738_v17, 0 }
 0x162   : > { %2324 = vmatpush3.bf16.xpose.msra.mxu0 %v744_v18 }
 0x163   : > { %2329 = vmatprep.subr.bf16.mxu0 %v2596_v3 }
 0x164   : > { %v788_v19 = vpop.permute.xlu0 %787 }
 0x165   : > { %v793_v20 = vsel %vm739_vm3, %v788_v19, 0 }
 0x169   : > { %2326 = vmatmul.mubr.msk.bf16.vlgmr.msra.gmra.mxu0 %vm739_vm3, %v2789_v12 }
 0x16a   : > { %2330 = vmatpush3.bf16.xpose.msra.mxu0 %v793_v20  ;;  %2331 = vmatprep.mubr.msk.bf16.mxu0 %vm2597_vm1, %v2596_v3 }
 0x16b   : > { %2341 = vmatprep.subr.bf16.mxu0 %v2596_v3 }
 0x171   : > { %2332 = vmatmul.mubr.msk.bf16.vlgmr.msra.gmra.mxu0 %vm739_vm3, %v2792_v16 }
 0x172   : > { %2343 = vmatprep.mubr.msk.bf16.mxu0 %vm2597_vm1, %v2596_v3 }
 0x229   : > { %v780_v21 = vpop.f32.mrf.mxu0 }
 0x22a   : > { %v835_v22 = vsel %vm739_vm3, %v780_v21, -inf }
 0x22b   : > { %836 = vmax.xlane.f32.xlu1 %v835_v22  ;;  %v2327_v23 = vpop.f32.mrf.mxu0 }
 0x22d   : > { %v783_v24 = vpop.f32.mrf.mxu0 }
 0x22f   : > { %v2328_v25 = vpop.f32.mrf.mxu0 }
 0x231   : > { %v829_v26 = vpop.f32.mrf.mxu0 }
 0x232   : > { %v838_v27 = vsel %vm739_vm3, %v829_v26, -inf }
 0x233   : > { %839 = vmax.xlane.f32.xlu1 %v838_v27  ;;  %v2333_v28 = vpop.f32.mrf.mxu0 }
 0x235   : > { %v832_v29 = vpop.f32.mrf.mxu0 }
 0x237   : > { %v2334_v30 = vpop.f32.mrf.mxu0 }
 0x244   : > { %859 = vrot.lane.b32.xlu1 %v2789_v12, %s2599_s22 }
 0x248   : > { %908 = vrot.lane.b32.xlu1 %v2792_v16, %s2599_s22  ;;  %s2610_s22 = smov 16  }
 0x24c   : > { %958 = vrot.lane.b32.xlu1 %v2789_v12, %s2600_s21 }
 0x2b4   : > { %v837_v31 = vpop.xlane.xlu1 %836 }
 0x2b5   : > { %v841_v32 = vsub.f32 %v780_v21, %v837_v31 }
 0x2b7   : > { %v843_v33 = vmul.f32 1.442695, %v841_v32 }
 0x2b9   : > { %2516 = vpow2.f32 %v843_v33 }
 0x2bc   : > { %v840_v34 = vpop.xlane.xlu1 %839 }
 0x2bd   : > { %v842_v35 = vsub.f32 %v829_v26, %v840_v34 }
 0x2bf   : > { %v845_v36 = vmul.f32 1.442695, %v842_v35 }
 0x2c0   : > { %v860_v37 = vpop.permute.xlu1 %859 }
 0x2c1   : > { %2518 = vpow2.f32 %v845_v36  ;;  %v866_v38 = vsel %vm864_vm4, %v860_v37, 0 }
 0x2c2   : > { %2336 = vmatpush3.bf16.msra.mxu1 %v866_v38 }
 0x2c3   : > { %2347 = vmatprep.subr.bf16.mxu1 %v2596_v3 }
 0x2c4   : > { %v909_v39 = vpop.permute.xlu1 %908 }
 0x2c5   : > { %v914_v40 = vsel %vm864_vm4, %v909_v39, 0 }
 0x2c6   : > { %v2517_v41 = vpop.eup %2516  ;;  %2342 = vmatpush3.bf16.msra.mxu0 %v914_v40 }
 0x2c7   : > { %v847_v42 = vsel %vm739_vm3, %v2517_v41, 0.0  ;;  %2353 = vmatprep.subr.bf16.mxu0 %v2596_v3 }
 0x2c8   : > { %848 = vadd.xlane.f32.xlu0 %v847_v42  ;;  %v959_v46 = vpop.permute.xlu1 %958 }
 0x2c9   : > { %v964_v51 = vsel %vm739_vm3, %v959_v46, 0 }
 0x2ce   : > { %v2519_v43 = vpop.eup %2518 }
 0x2cf   : > { %v850_v44 = vsel %vm739_vm3, %v2519_v43, 0.0 }
 0x2d0   : > { %851 = vadd.xlane.f32.xlu1 %v850_v44 }
 0x2de   : > { %956 = vrot.lane.b32.xlu0 %v2789_v12, %s2601_s25 }
 0x2e1   : > { %1008 = vrot.lane.b32.xlu1 %v2792_v16, %s2600_s21  ;;  %s2611_s21 = smov 24  }
 0x2e5   : > { %1006 = vrot.lane.b32.xlu1 %v2792_v16, %s2601_s25 }
 0x351   : > { %v849_v45 = vpop.xlane.xlu0 %848 }
 0x352   : > { %2520 = vrcp.f32 %v849_v45 }
 0x355   : > { %v957_v56 = vpop.permute.xlu0 %956 }
 0x359   : > { %v852_v47 = vpop.xlane.xlu1 %851 }
 0x35a   : > { %2522 = vrcp.f32 %v852_v47 }
 0x35d   : > { %v1009_v54 = vpop.permute.xlu1 %1008 }
 0x35e   : > { %v1014_v57 = vsel %vm739_vm3, %v1009_v54, 0 }
 0x35f   : > { %v2521_v48 = vpop.eup %2520 }
 0x360   : > { %v855_v49 = vmul.f32 %v2521_v48, %v2517_v41 }
 0x361   : > { %v1007_v58 = vpop.permute.xlu1 %1006 }
 0x362   : > { %v857_v50 = vpack.c.bf16 %v855_v49, %v855_v49 }
 0x364   : > { %2338 = vmatmul.mubr.msk.bf16.vlgmr.msra.gmra.mxu1 %vm739_vm3, %v857_v50 }
 0x365   : > { %2348 = vmatpush3.bf16.xpose.msra.mxu1 %v964_v51  ;;  %2349 = vmatprep.mubr.msk.bf16.mxu1 %vm2597_vm1, %v2596_v3 }
 0x366   : > { %2359 = vmatprep.subr.bf16.mxu1 %v2596_v3 }
 0x367   : > { %v2523_v52 = vpop.eup %2522 }
 0x368   : > { %v856_v53 = vmul.f32 %v2523_v52, %v2519_v43 }
 0x36a   : > { %v858_v55 = vpack.c.bf16 %v856_v53, %v856_v53 }
 0x36c   : > { %2344 = vmatmul.mubr.msk.bf16.vlgmr.msra.gmra.mxu0 %vm739_vm3, %v858_v55  ;;  %2350 = vmatmul.mubr.msk.bf16.vlgmr.msra.gmra.mxu1 %vm739_vm3, %v957_v56 }
 0x36d   : > { %2354 = vmatpush3.bf16.xpose.msra.mxu0 %v1014_v57  ;;  %2355 = vmatprep.mubr.msk.bf16.mxu0 %vm2597_vm1, %v2596_v3 }
 0x36e   : > { %2365 = vmatprep.subr.bf16.mxu0 %v2596_v3  ;;  %2361 = vmatprep.mubr.msk.bf16.mxu1 %vm2597_vm1, %v2596_v3 }
 0x374   : > { %2356 = vmatmul.mubr.msk.bf16.vlgmr.msra.gmra.mxu0 %vm739_vm3, %v1007_v58 }
 0x375   : > { %2367 = vmatprep.mubr.msk.bf16.mxu0 %vm2597_vm1, %v2596_v3 }
 0x424   : > { %v2837_v59 = vpop.f32.mrf.mxu1 }
 0x426   : > { %v2339_v60 = vpop.f32.mrf.mxu1 }
 0x428   : > { %v905_v61 = vpop.f32.mrf.mxu1 }
 0x42a   : > { %v2340_v62 = vpop.f32.mrf.mxu1 }
 0x42c   : > { %v2839_v63 = vpop.f32.mrf.mxu0  ;;  %v1000_v0 = vpop.f32.mrf.mxu1 }
 0x42d   : > { %v1056_v1 = vsel %vm739_vm3, %v1000_v0, -inf }
 0x42e   : > { %1057 = vmax.xlane.f32.xlu1 %v1056_v1  ;;  %v2345_v2 = vpop.f32.mrf.mxu0  ;;  %v2351_v4 = vpop.f32.mrf.mxu1 }
 0x430   : > { %v953_v7 = vpop.f32.mrf.mxu0  ;;  %v1003_v8 = vpop.f32.mrf.mxu1 }
 0x432   : > { %v2346_v9 = vpop.f32.mrf.mxu0  ;;  %v2352_v10 = vpop.f32.mrf.mxu1 }
 0x434   : > { %v1050_v11 = vpop.f32.mrf.mxu0 }
 0x435   : > { %v1059_v13 = vsel %vm739_vm3, %v1050_v11, -inf }
 0x436   : > { %1060 = vmax.xlane.f32.xlu0 %v1059_v13  ;;  %v2357_v14 = vpop.f32.mrf.mxu0 }
 0x438   : > { %v1053_v15 = vpop.f32.mrf.mxu0 }
 0x43a   : > { %v2358_v17 = vpop.f32.mrf.mxu0 }
 0x43f   : > { %1080 = vrot.lane.b32.xlu1 %v2789_v12, %s2602_s28 }
 0x443   : > { %1178 = vrot.lane.b32.xlu1 %v2789_v12, %s2603_s29 }
 0x44c   : > { %1128 = vrot.lane.b32.xlu0 %v2792_v16, %s2602_s28  ;;  %s3062_s28 = scalar_lea.vmem %s3037_s4, %s2706_s20 }
 0x450   : > { %1176 = vrot.lane.b32.xlu0 %v2789_v12, %s2604_s3 }
 0x4b7   : > { %v1058_v18 = vpop.xlane.xlu1 %1057 }
 0x4b8   : > { %v1062_v19 = vsub.f32 %v1000_v0, %v1058_v18 }
 0x4ba   : > { %v1064_v20 = vmul.f32 1.442695, %v1062_v19 }
 0x4bb   : > { %v1081_v21 = vpop.permute.xlu1 %1080 }
 0x4bc   : > { %2524 = vpow2.f32 %v1064_v20  ;;  %v1086_v22 = vsel %vm864_vm4, %v1081_v21, 0 }
 0x4bd   : > { %2360 = vmatpush3.bf16.msra.mxu1 %v1086_v22 }
 0x4be   : > { %2371 = vmatprep.subr.bf16.mxu1 %v2596_v3 }
 0x4bf   : > { %v1061_v23 = vpop.xlane.xlu0 %1060  ;;  %v1179_v32 = vpop.permute.xlu1 %1178 }
 0x4c0   : > { %v1063_v24 = vsub.f32 %v1050_v11, %v1061_v23  ;;  %v1184_v38 = vsel %vm739_vm3, %v1179_v32, 0 }
 0x4c2   : > { %v1066_v25 = vmul.f32 1.442695, %v1063_v24 }
 0x4c3   : > { %v1129_v26 = vpop.permute.xlu0 %1128 }
 0x4c4   : > { %2526 = vpow2.f32 %v1066_v25  ;;  %v1134_v27 = vsel %vm864_vm4, %v1129_v26, 0 }
 0x4c5   : > { %2366 = vmatpush3.bf16.msra.mxu0 %v1134_v27 }
 0x4c6   : > { %2377 = vmatprep.subr.bf16.mxu0 %v2596_v3 }
 0x4c7   : > { %v1177_v43 = vpop.permute.xlu0 %1176 }
 0x4c9   : > { %v2525_v28 = vpop.eup %2524 }
 0x4ca   : > { %v1068_v29 = vsel %vm739_vm3, %v2525_v28, 0.0 }
 0x4cb   : > { %1069 = vadd.xlane.f32.xlu1 %v1068_v29 }
 0x4d1   : > { %v2527_v30 = vpop.eup %2526 }
 0x4d2   : > { %v1071_v31 = vsel %vm739_vm3, %v2527_v30, 0.0 }
 0x4d3   : > { %1072 = vadd.xlane.f32.xlu1 %v1071_v31 }
 0x4e4   : > { %1228 = vrot.lane.b32.xlu1 %v2792_v16, %s2603_s29  ;;  %s3066_s29 = sld [smem:[#allocation11_spill]] (!%p2254_p5) }
 0x4e8   : > { %1226 = vrot.lane.b32.xlu1 %v2792_v16, %s2604_s3  ;;  %s3063_s3 = scalar_lea.vmem %s3038_s5, %s2706_s20 }
 0x554   : > { %v1070_v33 = vpop.xlane.xlu1 %1069 }
 0x555   : > { %2528 = vrcp.f32 %v1070_v33 }
 0x55c   : > { %v1073_v34 = vpop.xlane.xlu1 %1072 }
 0x55d   : > { %2530 = vrcp.f32 %v1073_v34 }
 0x560   : > { %v1229_v41 = vpop.permute.xlu1 %1228 }
 0x561   : > { %v1234_v44 = vsel %vm739_vm3, %v1229_v41, 0 }
 0x562   : > { %v2529_v35 = vpop.eup %2528 }
 0x563   : > { %v1076_v36 = vmul.f32 %v2529_v35, %v2525_v28 }
 0x564   : > { %v1227_v45 = vpop.permute.xlu1 %1226 }
 0x565   : > { %v1078_v37 = vpack.c.bf16 %v1076_v36, %v1076_v36 }
 0x567   : > { %2362 = vmatmul.mubr.msk.bf16.vlgmr.msra.gmra.mxu1 %vm739_vm3, %v1078_v37 }
 0x568   : > { %2372 = vmatpush3.bf16.xpose.msra.mxu1 %v1184_v38  ;;  %2373 = vmatprep.mubr.msk.bf16.mxu1 %vm2597_vm1, %v2596_v3 }
 0x569   : > { %2383 = vmatprep.subr.bf16.mxu1 %v2596_v3 }
 0x56a   : > { %v2531_v39 = vpop.eup %2530 }
 0x56b   : > { %v1077_v40 = vmul.f32 %v2531_v39, %v2527_v30 }
 0x56d   : > { %v1079_v42 = vpack.c.bf16 %v1077_v40, %v1077_v40 }
 0x56f   : > { %2368 = vmatmul.mubr.msk.bf16.vlgmr.msra.gmra.mxu0 %vm739_vm3, %v1079_v42  ;;  %2374 = vmatmul.mubr.msk.bf16.vlgmr.msra.gmra.mxu1 %vm739_vm3, %v1177_v43 }
 0x570   : > { %2378 = vmatpush3.bf16.xpose.msra.mxu0 %v1234_v44  ;;  %2379 = vmatprep.mubr.msk.bf16.mxu0 %vm2597_vm1, %v2596_v3 }
 0x571   : > { %2389 = vmatprep.subr.bf16.mxu0 %v2596_v3  ;;  %2385 = vmatprep.mubr.msk.bf16.mxu1 %vm2597_vm1, %v2596_v3 }
 0x577   : > { %2380 = vmatmul.mubr.msk.bf16.vlgmr.msra.gmra.mxu0 %vm739_vm3, %v1227_v45 }
 0x578   : > { %2391 = vmatprep.mubr.msk.bf16.mxu0 %vm2597_vm1, %v2596_v3 }
 0x627   : > { %v2871_v46 = vpop.f32.mrf.mxu1 }
 0x629   : > { %v2363_v47 = vpop.f32.mrf.mxu1 }
 0x62b   : > { %v1125_v48 = vpop.f32.mrf.mxu1 }
 0x62d   : > { %v2364_v49 = vpop.f32.mrf.mxu1 }
 0x62f   : > { %v2873_v50 = vpop.f32.mrf.mxu0  ;;  %v1220_v51 = vpop.f32.mrf.mxu1 }
 0x630   : > { %v2487_v52 = vpack.i.bf16 %v2873_v50, %v2871_v46  ;;  %v1276_v53 = vsel %vm739_vm3, %v1220_v51, -inf }
 0x631   : > { %1277 = vmax.xlane.f32.xlu0 %v1276_v53  ;;  %v2369_v54 = vpop.f32.mrf.mxu0  ;;  %v2375_v55 = vpop.f32.mrf.mxu1 }
 0x633   : > { %v1173_v56 = vpop.f32.mrf.mxu0  ;;  %v1223_v57 = vpop.f32.mrf.mxu1 }
 0x635   : > { %v2370_v58 = vpop.f32.mrf.mxu0  ;;  %v2376_v60 = vpop.f32.mrf.mxu1 }
 0x637   : > { %v1270_v61 = vpop.f32.mrf.mxu0 }
 0x638   : > { %v1279_v62 = vsel %vm739_vm3, %v1270_v61, -inf }
 0x639   : > { %1280 = vmax.xlane.f32.xlu1 %v1279_v62  ;;  %v2381_v0 = vpop.f32.mrf.mxu0 }
 0x63b   : > { %v1273_v1 = vpop.f32.mrf.mxu0 }
 0x63d   : > { %v2382_v2 = vpop.f32.mrf.mxu0 }
 0x64a   : > { %1300 = vrot.lane.b32.xlu1 %v2789_v12, %s2605_s17 }
 0x64e   : > { %1398 = vrot.lane.b32.xlu1 %v2789_v12, %s2606_s27 }
 0x652   : > { %1448 = vrot.lane.b32.xlu1 %v2792_v16, %s2606_s27 }
 0x656   : > { %1446 = vrot.lane.b32.xlu1 %v2792_v16, %s2607_s23 }
 0x6ba   : > { %v1278_v4 = vpop.xlane.xlu0 %1277 }
 0x6bb   : > { %v1282_v7 = vsub.f32 %v1220_v51, %v1278_v4 }
 0x6bd   : > { %v1284_v8 = vmul.f32 1.442695, %v1282_v7 }
 0x6bf   : > { %2532 = vpow2.f32 %v1284_v8 }
 0x6c2   : > { %v1281_v9 = vpop.xlane.xlu1 %1280 }
 0x6c3   : > { %v1283_v10 = vsub.f32 %v1270_v61, %v1281_v9 }
 0x6c5   : > { %v1286_v11 = vmul.f32 1.442695, %v1283_v10 }
 0x6c6   : > { %v1301_v13 = vpop.permute.xlu1 %1300 }
 0x6c7   : > { %2534 = vpow2.f32 %v1286_v11  ;;  %v1306_v14 = vsel %vm864_vm4, %v1301_v13, 0 }
 0x6c8   : > { %2384 = vmatpush3.bf16.msra.mxu1 %v1306_v14 }
 0x6c9   : > { %2395 = vmatprep.subr.bf16.mxu1 %v2596_v3 }
 0x6ca   : > { %v1399_v26 = vpop.permute.xlu1 %1398 }
 0x6cb   : > { %v1404_v28 = vsel %vm739_vm3, %v1399_v26, 0 }
 0x6cc   : > { %v2533_v15 = vpop.eup %2532 }
 0x6cd   : > { %v1288_v17 = vsel %vm739_vm3, %v2533_v15, 0.0 }
 0x6ce   : > { %1289 = vadd.xlane.f32.xlu0 %v1288_v17  ;;  %v1449_v31 = vpop.permute.xlu1 %1448 }
 0x6cf   : > { %v1454_v34 = vsel %vm739_vm3, %v1449_v31, 0 }
 0x6d2   : > { %v1447_v35 = vpop.permute.xlu1 %1446 }
 0x6d4   : > { %v2535_v18 = vpop.eup %2534 }
 0x6d5   : > { %v1291_v19 = vsel %vm739_vm3, %v2535_v18, 0.0 }
 0x6d6   : > { %1292 = vadd.xlane.f32.xlu0 %v1291_v19  ;;  %v2505_v19 = vld [vmem:[%s2719_s30] sm:$0xff]  }
 0x6ec   : > { %1348 = vrot.lane.b32.xlu0 %v2792_v16, %s2605_s17 }
 0x6f0   : > { %1396 = vrot.lane.b32.xlu0 %v2789_v12, %s2607_s23  ;;  %s3064_s23 = scalar_lea.vmem %s3039_s6, %s2706_s20 }
 0x757   : > { %v1290_v20 = vpop.xlane.xlu0 %1289 }
 0x758   : > { %2536 = vrcp.f32 %v1290_v20 }
 0x75f   : > { %v1293_v21 = vpop.xlane.xlu0 %1292 }
 0x760   : > { %2538 = vrcp.f32 %v1293_v21 }
 0x763   : > { %v1349_v22 = vpop.permute.xlu0 %1348 }
 0x764   : > { %v1354_v23 = vsel %vm864_vm4, %v1349_v22, 0 }
 0x765   : > { %v2537_v24 = vpop.eup %2536  ;;  %2390 = vmatpush3.bf16.msra.mxu0 %v1354_v23 }
 0x766   : > { %v1296_v25 = vmul.f32 %v2537_v24, %v2533_v15  ;;  %2401 = vmatprep.subr.bf16.mxu0 %v2596_v3 }
 0x767   : > { %v1397_v33 = vpop.permute.xlu0 %1396 }
 0x768   : > { %v1298_v27 = vpack.c.bf16 %v1296_v25, %v1296_v25 }
 0x76a   : > { %2386 = vmatmul.mubr.msk.bf16.vlgmr.msra.gmra.mxu1 %vm739_vm3, %v1298_v27 }
 0x76b   : > { %2396 = vmatpush3.bf16.xpose.msra.mxu1 %v1404_v28  ;;  %2397 = vmatprep.mubr.msk.bf16.mxu1 %vm2597_vm1, %v2596_v3 }
 0x76c   : > { %2407 = vmatprep.subr.bf16.mxu1 %v2596_v3 }
 0x76d   : > { %v2539_v29 = vpop.eup %2538 }
 0x76e   : > { %v1297_v30 = vmul.f32 %v2539_v29, %v2535_v18  ;;  %v2504_v18 = vld [vmem:[%s2719_s30 + $0x8] sm:$0xff]  }
 0x770   : > { %v1299_v32 = vpack.c.bf16 %v1297_v30, %v1297_v30 }
 0x772   : > { %2392 = vmatmul.mubr.msk.bf16.vlgmr.msra.gmra.mxu0 %vm739_vm3, %v1299_v32  ;;  %2398 = vmatmul.mubr.msk.bf16.vlgmr.msra.gmra.mxu1 %vm739_vm3, %v1397_v33 }
 0x773   : > { %2402 = vmatpush3.bf16.xpose.msra.mxu0 %v1454_v34  ;;  %2403 = vmatprep.mubr.msk.bf16.mxu0 %vm2597_vm1, %v2596_v3 }
 0x774   : > { %2413 = vmatprep.subr.bf16.mxu0 %v2596_v3  ;;  %2409 = vmatprep.mubr.msk.bf16.mxu1 %vm2597_vm1, %v2596_v3 }
 0x77a   : > { %2404 = vmatmul.mubr.msk.bf16.vlgmr.msra.gmra.mxu0 %vm739_vm3, %v1447_v35 }
 0x77b   : > { %2415 = vmatprep.mubr.msk.bf16.mxu0 %vm2597_vm1, %v2596_v3 }
 0x82a   : > { %v1342_v36 = vpop.f32.mrf.mxu1 }
 0x82c   : > { %v2387_v37 = vpop.f32.mrf.mxu1 }
 0x82e   : > { %v1345_v38 = vpop.f32.mrf.mxu1 }
 0x830   : > { %v2388_v39 = vpop.f32.mrf.mxu1 }
 0x832   : > { %v1390_v40 = vpop.f32.mrf.mxu0  ;;  %v1440_v41 = vpop.f32.mrf.mxu1 }
 0x833   : > { %v1496_v42 = vsel %vm739_vm3, %v1440_v41, -inf  ;;  %v2492_v57 = vpack.i.bf16 %v1390_v40, %v1342_v36 }
 0x834   : > { %1497 = vmax.xlane.f32.xlu0 %v1496_v42  ;;  %v2393_v43 = vpop.f32.mrf.mxu0  ;;  %v2399_v44 = vpop.f32.mrf.mxu1 }
 0x836   : > { %v1393_v45 = vpop.f32.mrf.mxu0  ;;  %v1443_v47 = vpop.f32.mrf.mxu1 }
 0x838   : > { %v2394_v48 = vpop.f32.mrf.mxu0  ;;  %v2400_v49 = vpop.f32.mrf.mxu1 }
 0x83a   : > { %v1490_v51 = vpop.f32.mrf.mxu0 }
 0x83b   : > { %v1499_v53 = vsel %vm739_vm3, %v1490_v51, -inf }
 0x83c   : > { %1500 = vmax.xlane.f32.xlu1 %v1499_v53  ;;  %v2405_v54 = vpop.f32.mrf.mxu0 }
 0x83e   : > { %v1493_v55 = vpop.f32.mrf.mxu0 }
 0x840   : > { %v2406_v56 = vpop.f32.mrf.mxu0 }
 0x84d   : > { %1520 = vrot.lane.b32.xlu1 %v2789_v12, %s2608_s14 }
 0x851   : > { %2488 = vrot.lane.b32.xlu1 %v2487_v52, %s2609_s15 }
 0x855   : > { %2493 = vrot.lane.b32.xlu1 %v2492_v57, %s2610_s22 }
 0x8bd   : > { %v1498_v58 = vpop.xlane.xlu0 %1497 }
 0x8be   : > { %v1502_v60 = vsub.f32 %v1440_v41, %v1498_v58 }
 0x8c0   : > { %v1504_v61 = vmul.f32 1.442695, %v1502_v60 }
 0x8c2   : > { %2540 = vpow2.f32 %v1504_v61 }
 0x8c5   : > { %v1501_v62 = vpop.xlane.xlu1 %1500 }
 0x8c6   : > { %v1503_v0 = vsub.f32 %v1490_v51, %v1501_v62 }
 0x8c8   : > { %v1506_v1 = vmul.f32 1.442695, %v1503_v0 }
 0x8c9   : > { %v1521_v2 = vpop.permute.xlu1 %1520 }
 0x8ca   : > { %2542 = vpow2.f32 %v1506_v1  ;;  %v1526_v12 = vsel %vm864_vm4, %v1521_v2, 0 }
 0x8cb   : > { %2408 = vmatpush3.bf16.msra.mxu1 %v1526_v12  ;;  %v2506_v12 = vld [vmem:[%s2736_s26 + $0x8] sm:$0xff]  }
 0x8cc   : > { %2419 = vmatprep.subr.bf16.mxu1 %v2596_v3 }
 0x8cd   : > { %v2489_v29 = vpop.permute.xlu1 %2488 }
 0x8ce   : > { %v2491_v31 = vunpack.i.h.bf16 %v2489_v29  ;;  %v2490_v32 = vunpack.i.l.bf16 %v2489_v29  ;;  %v2515_v29 = vld [vmem:[%s2746_s18] sm:$0xff]  }
 0x8cf   : > { %v2541_v4 = vpop.eup %2540 }
 0x8d0   : > { %v1508_v46 = vsel %vm739_vm3, %v2541_v4, 0.0  ;;  %v1641_v36 = vsel %vm739_vm3, %v2839_v63, %v2491_v31  ;;  %v1640_v37 = vsel %vm739_vm3, %v2837_v59, %v2490_v32  ;;  %v2233_v63 = vld [vmem:[%s3062_s28] ss:$0 sm:$0xff] }
 0x8d1   : > { %1509 = vadd.xlane.f32.xlu0 %v1508_v46  ;;  %v2494_v30 = vpop.permute.xlu1 %2493  ;;  %v2508_v46 = vld [vmem:[%s2746_s18 + $0x38] sm:$0xff]  }
 0x8d2   : > { %v2496_v33 = vunpack.i.h.bf16 %v2494_v30  ;;  %v2495_v34 = vunpack.i.l.bf16 %v2494_v30  ;;  %v2239_v30 = vld [vmem:[%s638_s1] ss:$0 sm:$0xff] }
 0x8d4   : > { %v1643_v40 = vsel %vm1642_vm5, %v1640_v37, %v2495_v34  ;;  %v1644_v41 = vsel %vm1642_vm5, %v1641_v36, %v2496_v33 }
 0x8d7   : > { %v2543_v50 = vpop.eup %2542 }
 0x8d8   : > { %v1511_v52 = vsel %vm739_vm3, %v2543_v50, 0.0 }
 0x8d9   : > { %1512 = vadd.xlane.f32.xlu0 %v1511_v52  ;;  %v2510_v52 = vld [vmem:[%s2746_s18 + $0x28] sm:$0xff]  }
 0x8ef   : > { %1568 = vrot.lane.b32.xlu0 %v2792_v16, %s2608_s14 }
 0x95a   : > { %v1510_v7 = vpop.xlane.xlu0 %1509 }
 0x95b   : > { %2544 = vrcp.f32 %v1510_v7  ;;  %v2511_v7 = vld [vmem:[%s2746_s18 + $0x20] sm:$0xff]  }
 0x962   : > { %v1513_v8 = vpop.xlane.xlu0 %1512 }
 0x963   : > { %2546 = vrcp.f32 %v1513_v8  ;;  %v2512_v8 = vld [vmem:[%s2746_s18 + $0x18] sm:$0xff]  }
 0x966   : > { %v1569_v9 = vpop.permute.xlu0 %1568 }
 0x967   : > { %v1574_v10 = vsel %vm864_vm4, %v1569_v9, 0 }
 0x968   : > { %v2545_v11 = vpop.eup %2544  ;;  %2414 = vmatpush3.bf16.msra.mxu0 %v1574_v10 }
 0x969   : > { %v1516_v13 = vmul.f32 %v2545_v11, %v2541_v4  ;;  %2427 = vmatprep.subr.bf16.mxu0 %v2596_v3  ;;  %v2507_v4 = vld [vmem:[%s2736_s26] sm:$0xff]  }
 0x96b   : > { %v1518_v14 = vpack.c.bf16 %v1516_v13, %v1516_v13 }
 0x96d   : > { %2410 = vmatmul.mubr.msk.bf16.vlgmr.msra.gmra.mxu1 %vm739_vm3, %v1518_v14 }
 0x96e   : > { %2423 = vmatprep.mubr.msk.bf16.mxu1 %vm2597_vm1, %v2596_v3  ;;  %2420 = vmatpush3.bf16.msra.mxu1 %v2504_v18  ;;  %v2237_v18 = vld [vmem:[%s3063_s3] ss:$0 sm:$0xff] }
 0x96f   : > { %2421 = vmatprep.subr.bf16.mxu1 %v2596_v3 }
 0x970   : > { %v2547_v16 = vpop.eup %2546 }
 0x971   : > { %v1517_v15 = vmul.f32 %v2547_v16, %v2543_v50  ;;  %v2509_v50 = vld [vmem:[%s2746_s18 + $0x30] sm:$0xff]  }
 0x972   : > { %2422 = vmatpush3.bf16.msra.mxu1 %v2505_v19 }
 0x973   : > { %v1519_v17 = vpack.c.bf16 %v1517_v15, %v1517_v15  ;;  %2435 = vmatprep.subr.bf16.mxu1 %v2596_v3 }
 0x975   : > { %2416 = vmatmul.mubr.msk.bf16.vlgmr.msra.gmra.mxu0 %vm739_vm3, %v1519_v17 }
 0x976   : > { %2431 = vmatprep.mubr.msk.bf16.mxu0 %vm2597_vm1, %v2596_v3  ;;  %2428 = vmatpush3.bf16.msra.mxu0 %v2506_v12 }
 0x977   : > { %2429 = vmatprep.subr.bf16.mxu0 %v2596_v3 }
 0x97a   : > { %2430 = vmatpush3.bf16.msra.mxu0 %v2507_v4  ;;  %v2252_v4 = vld [vmem:[%s649_s24] ss:$0 sm:$0xff]  ;;  %s3065_s24 = sld [smem:[#allocation10_spill]] (!%p2254_p5) }
 0xa2d   : > { %v1562_v20 = vpop.f32.mrf.mxu1 }
 0xa2f   : > { %v2411_v21 = vpop.f32.mrf.mxu1 }
 0xa31   : > { %v1565_v22 = vpop.f32.mrf.mxu1 }
 0xa32   : > { %v2238_v22 = vld [vmem:[%s3064_s23] ss:$0 sm:$0xff] }
 0xa33   : > { %v2412_v23 = vpop.f32.mrf.mxu1 }
 0xa35   : > { %v1610_v24 = vpop.f32.mrf.mxu0 }
 0xa36   : > { %v2497_v25 = vpack.i.bf16 %v1610_v24, %v1562_v20 }
 0xa37   : > { %v2417_v26 = vpop.f32.mrf.mxu0 }
 0xa38   : > { %2498 = vrot.lane.b32.xlu0 %v2497_v25, %s2611_s21 }
 0xa39   : > { %v1613_v27 = vpop.f32.mrf.mxu0 }
 0xa3a   : > { %v2513_v27 = vld [vmem:[%s2746_s18 + $0x10] sm:$0xff]  }
 0xa3b   : > { %v2418_v28 = vpop.f32.mrf.mxu0 }
 0xa3c   : > { %v2514_v28 = vld [vmem:[%s2746_s18 + $0x8] sm:$0xff]  }
 0xaaa   : > { %v2499_v35 = vpop.permute.xlu0 %2498 }
 0xaab   : > { %v2501_v38 = vunpack.i.h.bf16 %v2499_v35  ;;  %v2500_v39 = vunpack.i.l.bf16 %v2499_v35 }
 0xaad   : > { %v1647_v42 = vsel %vm1645_vm6, %v1644_v41, %v2501_v38  ;;  %v1646_v43 = vsel %vm1645_vm6, %v1643_v40, %v2500_v39 }
 0xaae   : > { %v1648_v44 = vpack.c.bf16 %v1647_v42, %v1646_v43 }
 0xab0   : > { %2424 = vmatmul.mubr.msk.bf16.vlgmr.msra.gmra.mxu1 %vm689_vm2, %v1648_v44 }
 0xab1   : > { %2451 = vmatprep.mubr.msk.bf16.mxu1 %vm2597_vm1, %v2596_v3  ;;  %2436 = vmatpush3.bf16.msra.mxu1 %v2508_v46 }
 0xab2   : > { %2437 = vmatprep.subr.bf16.mxu1 %v2596_v3 }
 0xab5   : > { %2438 = vmatpush3.bf16.msra.mxu1 %v2509_v50  ;;  %v2253_v50 = vld [vmem:[%s652_s13] ss:$0 sm:$0xff] }
 0xab6   : > { %2439 = vmatprep.subr.bf16.mxu1 %v2596_v3 }
 0xab9   : > { %2440 = vmatpush3.bf16.msra.mxu1 %v2510_v52 }
 0xaba   : > { %2441 = vmatprep.subr.bf16.mxu1 %v2596_v3 }
 0xabd   : > { %2442 = vmatpush3.bf16.msra.mxu1 %v2511_v7 }
 0xabe   : > { %2443 = vmatprep.subr.bf16.mxu1 %v2596_v3 }
 0xac1   : > { %2444 = vmatpush3.bf16.msra.mxu1 %v2512_v8 }
 0xac2   : > { %2445 = vmatprep.subr.bf16.mxu1 %v2596_v3 }
 0xac5   : > { %2446 = vmatpush3.bf16.msra.mxu1 %v2513_v27 }
 0xac6   : > { %2447 = vmatprep.subr.bf16.mxu1 %v2596_v3 }
 0xac9   : > { %2448 = vmatpush3.bf16.msra.mxu1 %v2514_v28 }
 0xaca   : > { %2449 = vmatprep.subr.bf16.mxu1 %v2596_v3  ;;  %v2243_v3 = vld [vmem:[%s646_s0] ss:$0 sm:$0xff] }
 0xacd   : > { %2450 = vmatpush3.bf16.msra.mxu1 %v2515_v29 }
 0xb70   : > { %v1709_v45 = vpop.f32.mrf.mxu1 }
 0xb71   : > { %v1710_v47 = vadd.f32 %v2233_v63, %v1709_v45 }
 0xb72   : > { %v2425_v59 = vpop.f32.mrf.mxu1 }
 0xb73   : > { %v1716_v48 = vadd.f32 %v1710_v47, %v2771_v5 }
 0xb74   : > { %v1712_v49 = vpop.f32.mrf.mxu1 }
 0xb75   : > { %v1713_v51 = vadd.f32 %v2233_v63, %v1712_v49  ;;  %v1720_v53 = vsel %vm689_vm2, %v1716_v48, 0.0 }
 0xb76   : > { %1721 = vadd.xlane.f32.xlu1 %v1720_v53  ;;  %v2426_v54 = vpop.f32.mrf.mxu1 }
 0xb77   : > { %v1717_v55 = vadd.f32 %v1713_v51, %v2773_v6 }
 0xb79   : > { %v1723_v56 = vsel %vm689_vm2, %v1717_v55, 0.0 }
 0xb7a   : > { %1724 = vadd.xlane.f32.xlu0 %v1723_v56 }
 0xbff   : > { %v1722_v57 = vpop.xlane.xlu1 %1721 }
 0xc00   : > { %v1727_v58 = vmul.f32 0.03125, %v1722_v57 }
 0xc02   : > { %v1729_v60 = vsub.f32 %v1716_v48, %v1727_v58 }
 0xc03   : > { %v1725_v61 = vpop.xlane.xlu0 %1724 }
 0xc04   : > { %v1728_v5 = vmul.f32 0.03125, %v1725_v61  ;;  %v1731_v62 = vmul.f32 %v1729_v60, %v1729_v60 }
 0xc06   : > { %v1730_v0 = vsub.f32 %v1717_v55, %v1728_v5  ;;  %v1733_v1 = vsel %vm689_vm2, %v1731_v62, 0.0 }
 0xc07   : > { %1734 = vadd.xlane.f32.xlu0 %v1733_v1 }
 0xc08   : > { %v1732_v2 = vmul.f32 %v1730_v0, %v1730_v0 }
 0xc0a   : > { %v1736_v6 = vsel %vm689_vm2, %v1732_v2, 0.0 }
 0xc0b   : > { %1737 = vadd.xlane.f32.xlu1 %v1736_v6 }
 0xc90   : > { %v1735_v9 = vpop.xlane.xlu0 %1734 }
 0xc91   : > { %v1739_v10 = vmul.f32 0.03125, %v1735_v9 }
 0xc93   : > { %v1741_v11 = vadd.f32 1e-05, %v1739_v10 }
 0xc94   : > { %v1738_v13 = vpop.xlane.xlu1 %1737 }
 0xc95   : > { %2548 = vrsqrt.f32 %v1741_v11  ;;  %v1740_v14 = vmul.f32 0.03125, %v1738_v13 }
 0xc97   : > { %v1742_v16 = vadd.f32 1e-05, %v1740_v14 }
 0xc99   : > { %2550 = vrsqrt.f32 %v1742_v16 }
 0xca2   : > { %v2549_v15 = vpop.eup %2548 }
 0xca3   : > { %v1745_v17 = vmul.f32 %v2549_v15, %v1729_v60 }
 0xca5   : > { %v1753_v21 = vmul.f32 %v2237_v18, %v1745_v17 }
 0xca6   : > { %v2551_v19 = vpop.eup %2550 }
 0xca7   : > { %v1746_v20 = vmul.f32 %v2551_v19, %v1730_v0  ;;  %v1761_v24 = vadd.f32 %v2238_v22, %v1753_v21 }
 0xca9   : > { %v1754_v23 = vmul.f32 %v2237_v18, %v1746_v20 }
 0xcab   : > { %v1762_v25 = vadd.f32 %v2238_v22, %v1754_v23 }
 0xcad   : > { %v1763_v26 = vpack.c.bf16 %v1762_v25, %v1761_v24 }
 0xcaf   : > { %2432 = vmatmul.mubr.msk.bf16.vlgmr.msra.gmra.mxu0 %vm689_vm2, %v1763_v26 }
 0xd6f   : > { %v1824_v31 = vpop.f32.mrf.mxu0 }
 0xd70   : > { %v1825_v33 = vadd.f32 %v2239_v30, %v1824_v31 }
 0xd71   : > { %v2433_v32 = vpop.f32.mrf.mxu0 }
 0xd72   : > { %v1831_v37 = vmax.f32 %v1825_v33, 0.0 }
 0xd73   : > { %v1827_v34 = vpop.f32.mrf.mxu0 }
 0xd74   : > { %v1828_v35 = vadd.f32 %v2239_v30, %v1827_v34 }
 0xd75   : > { %v2434_v36 = vpop.f32.mrf.mxu0 }
 0xd76   : > { %v1832_v38 = vmax.f32 %v1828_v35, 0.0 }
 0xd78   : > { %v1833_v39 = vpack.c.bf16 %v1832_v38, %v1831_v37 }
 0xd7a   : > { %2452 = vmatmul.mubr.bf16.vlgmr.msra.gmra.mxu1 %v1833_v39 }
 0xe3a   : > { %v1939_v40 = vpop.f32.mrf.mxu1 }
 0xe3b   : > { %v1940_v41 = vadd.f32 %v2243_v3, %v1939_v40 }
 0xe3c   : > { %v2453_v42 = vpop.f32.mrf.mxu1 }
 0xe3d   : > { %v1946_v43 = vadd.f32 %v1940_v41, %v1761_v24 }
 0xe3e   : > { %v1942_v44 = vpop.f32.mrf.mxu1 }
 0xe3f   : > { %v1943_v63 = vadd.f32 %v2243_v3, %v1942_v44  ;;  %v1950_v45 = vsel %vm689_vm2, %v1946_v43, 0.0 }
 0xe40   : > { %1951 = vadd.xlane.f32.xlu0 %v1950_v45  ;;  %v2454_v47 = vpop.f32.mrf.mxu1 }
 0xe41   : > { %v1947_v59 = vadd.f32 %v1943_v63, %v1762_v25 }
 0xe43   : > { %v1953_v48 = vsel %vm689_vm2, %v1947_v59, 0.0 }
 0xe44   : > { %1954 = vadd.xlane.f32.xlu1 %v1953_v48 }
 0xec9   : > { %v1952_v49 = vpop.xlane.xlu0 %1951 }
 0xeca   : > { %v1956_v51 = vmul.f32 0.03125, %v1952_v49 }
 0xecc   : > { %v1958_v53 = vsub.f32 %v1946_v43, %v1956_v51 }
 0xecd   : > { %v1955_v54 = vpop.xlane.xlu1 %1954 }
 0xece   : > { %v1957_v55 = vmul.f32 0.03125, %v1955_v54  ;;  %v1960_v56 = vmul.f32 %v1958_v53, %v1958_v53 }
 0xed0   : > { %v1959_v57 = vsub.f32 %v1947_v59, %v1957_v55  ;;  %v1962_v58 = vsel %vm689_vm2, %v1960_v56, 0.0 }
 0xed1   : > { %1963 = vadd.xlane.f32.xlu0 %v1962_v58 }
 0xed2   : > { %v1961_v60 = vmul.f32 %v1959_v57, %v1959_v57 }
 0xed4   : > { %v1965_v61 = vsel %vm689_vm2, %v1961_v60, 0.0 }
 0xed5   : > { %1966 = vadd.xlane.f32.xlu1 %v1965_v61 }
 0xf5a   : > { %v1964_v5 = vpop.xlane.xlu0 %1963 }
 0xf5b   : > { %v1968_v62 = vmul.f32 0.03125, %v1964_v5 }
 0xf5d   : > { %v1970_v0 = vadd.f32 1e-05, %v1968_v62 }
 0xf5e   : > { %v1967_v1 = vpop.xlane.xlu1 %1966 }
 0xf5f   : > { %2552 = vrsqrt.f32 %v1970_v0  ;;  %v1969_v2 = vmul.f32 0.03125, %v1967_v1 }
 0xf61   : > { %v1971_v6 = vadd.f32 1e-05, %v1969_v2 }
 0xf63   : > { %2554 = vrsqrt.f32 %v1971_v6 }
 0xf6c   : > { %v2553_v12 = vpop.eup %2552 }
 0xf6d   : > { %v1974_v46 = vmul.f32 %v2553_v12, %v1958_v53 }
 0xf6f   : > { %v1982_v52 = vmul.f32 %v2252_v4, %v1974_v46 }
 0xf70   : > { %v2555_v7 = vpop.eup %2554 }
 0xf71   : > { %v1990_v8 = vadd.f32 %v2253_v50, %v1982_v52  ;;  %v1975_v9 = vmul.f32 %v2555_v7, %v1959_v57 }
 0xf73   : > { %1992 = vst.msk [vmem:[#allocation2] sm:$0xff] %vm689_vm2, %v1990_v8  ;;  %v1983_v10 = vmul.f32 %v2252_v4, %v1975_v9  ;;  %1997 = sbr.rel (%p2254_p5) target bundleno = 4273 (0x10b1), region = 88 }
 0xf75   : > { %v1991_v11 = vadd.f32 %v2253_v50, %v1983_v10 }
 0xf77   : > { %1993 = vst.msk [vmem:[#allocation2 + $0x8] sm:$0xff] %vm689_vm2, %v1991_v11 }
 0xf78   : > { %v2000_v13 = vsel %vm689_vm2, %v1990_v8, 0.0  ;;  %v2003_v14 = vsel %vm689_vm2, %v1991_v11, 0.0  ;;  %v2255_v32 = vld [vmem:[%s3065_s24] ss:$0 sm:$0xff] }
 0xf79   : > { %2001 = vadd.xlane.f32.xlu0 %v2000_v13  ;;  %v2256_v34 = vld [vmem:[%s3066_s29] ss:$0 sm:$0xff] }
 0xf7d   : > { %2004 = vadd.xlane.f32.xlu0 %v2003_v14 }
0x1002   : > { %v2002_v16 = vpop.xlane.xlu0 %2001 }
0x1003   : > { %v2006_v15 = vmul.f32 0.03125, %v2002_v16 }
0x1005   : > { %v2008_v17 = vsub.f32 %v1990_v8, %v2006_v15 }
0x1006   : > { %v2005_v18 = vpop.xlane.xlu0 %2004 }
0x1007   : > { %v2007_v19 = vmul.f32 0.03125, %v2005_v18  ;;  %v2010_v20 = vmul.f32 %v2008_v17, %v2008_v17 }
0x1009   : > { %v2009_v21 = vsub.f32 %v1991_v11, %v2007_v19  ;;  %v2012_v22 = vsel %vm689_vm2, %v2010_v20, 0.0 }
0x100a   : > { %2013 = vadd.xlane.f32.xlu1 %v2012_v22 }
0x100b   : > { %v2011_v23 = vmul.f32 %v2009_v21, %v2009_v21 }
0x100d   : > { %v2015_v24 = vsel %vm689_vm2, %v2011_v23, 0.0 }
0x100e   : > { %2016 = vadd.xlane.f32.xlu1 %v2015_v24 }
0x1093   : > { %v2014_v25 = vpop.xlane.xlu1 %2013 }
0x1094   : > { %v2018_v26 = vmul.f32 0.03125, %v2014_v25 }
0x1096   : > { %v2020_v27 = vadd.f32 1e-05, %v2018_v26 }
0x1097   : > { %v2017_v28 = vpop.xlane.xlu1 %2016 }
0x1098   : > { %2556 = vrsqrt.f32 %v2020_v27  ;;  %v2019_v29 = vmul.f32 0.03125, %v2017_v28 }
0x109a   : > { %v2021_v30 = vadd.f32 1e-05, %v2019_v29 }
0x109c   : > { %2558 = vrsqrt.f32 %v2021_v30 }
0x10a5   : > { %v2557_v31 = vpop.eup %2556 }
0x10a6   : > { %v2024_v33 = vmul.f32 %v2557_v31, %v2008_v17 }
0x10a8   : > { %v2032_v35 = vmul.f32 %v2255_v32, %v2024_v33 }
0x10a9   : > { %v2559_v36 = vpop.eup %2558 }
0x10aa   : > { %v2040_v37 = vadd.f32 %v2256_v34, %v2032_v35  ;;  %v2025_v38 = vmul.f32 %v2559_v36, %v2009_v21 }
0x10ac   : > { %2042 = vst.msk [vmem:[#allocation3] sm:$0xff] %vm689_vm2, %v2040_v37  ;;  %v2033_v39 = vmul.f32 %v2255_v32, %v2025_v38 }
0x10ae   : > { %v2041_v3 = vadd.f32 %v2256_v34, %v2033_v39 }
0x10b0   : > { %2043 = vst.msk [vmem:[#allocation3 + $0x8] sm:$0xff] %vm689_vm2, %v2041_v3 }
0x10b1 PF: > { %p2459_p6 = scmp.eq.s32.totalorder %s2700_s19, 1  ;;  %s2612_s3 = smov [#allocation3]  }
0x10b2   : > { %s2050_s17 = sshll.u32 %s2612_s3, 4  ;;  %s2051_s17 = int_to_ptr.vmem [resolvable:$true] %s2050_s17 }
0x10b3   : > { %s2560_s27 = scalar_lea.vmem %s2051_s17, 256  ;;  %p2567_p10 = scmp.lt.s32.totalorder %s2051_s17, %s2051_s17 }
0x10b4   : > { %p2561_p7 = scmp.ne.s32.totalorder %s2051_s17, %s2560_s27  ;;  %p2568_p11 = scmp.lt.s32.totalorder %s2560_s27, %s2560_s27 }
0x10b6   : > { %p2562_p8 = pnand %p2561_p7, %p2459_p6  ;;  %p2569_p12 = por %p2568_p11, %p2567_p10 }
0x10b8   : > { %p2563_p9 = pneg %p2562_p8 }
0x10ba   : > { %p2570_p13 = pnand %p2569_p12, %p2563_p9 }
0x10bc   : > { %2573 = shalt.err (!%p2570_p13)
}
0x10bd   : > { %s2613_s23 = smov 128   ;;  %s3067_s21 = sld [smem:[#allocation12_spill]] }
0x10c3   : > { %2456 = dma.vmem_to_hbm [thread:$0]  (%p2459_p6), %s2051_s17, 256, %s3067_s21, [#allocation4], %s2613_s23, %s2613_s23, %s2609_s15  }
0x10c4   : > { %2589 = dma.done.wait (%p2459_p6), [#allocation4], 256  }
0x10c5   : > { %2591 = vsyncadd (%p2459_p6), [#allocation4], 4294967040 }
0x10c6 PF: > { %s3068_s30 = sld [smem:[#allocation6_spill]] }
0x10cc   : > { %s26_s18 = sadd.s32 1, %s3068_s30  }
0x10cd   : > { %p23_p0 = scmp.ge.s32.totalorder %s26_s18, 4  }
0x10cf   :  { %25 = sbr.rel (!%p23_p0) target bundleno = 8 (0x8), region = 148 }
0x10d4   :  { %2066 = vsyncpa [#allocation4], 1 }
0x10d5   :  { %2068 = vsyncpa [#allocation4 + $0x1], 1 }

</bundles_post_ra>
